<compile_context>
chip_gen: v5e
topology: v5e:2x2
jax: 0.10.0
libtpu: 0.0.40
codegen_flags: <defaults>
</compile_context>

<pallas_src>
import jax
import jax.numpy as jnp
from jax.experimental import pallas as pl
from jax.experimental.pallas import tpu as pltpu


def _round_up(x, m):
    return (x + m - 1) // m * m


# --------------------------------------------------------------------------
# Kernel
# --------------------------------------------------------------------------
def tispell_kernel(hid_ref, wlm_ref, blm_ref,
                   w1c_ref, b1c_ref, w1s_ref, b1s_ref,
                   w2c_ref, w2s_ref, b2c_ref, b2sum_ref,
                   logit_ref, logitc_ref,
                   logits_sc, h1c_sc, h1s_sc):
    """One grid step = (row tile i, stage st, vocab tile j).

    stage 0: logits[:, j]   = hidden @ W_lm[:, j] + b_lm[j]         -> bf16 scratch
    stage 1: h1_{c,s}[:, j] = relu(logits @ W1_{c,s}[:, j] + b1)    -> bf16 scratch
    stage 2: logit_c[:, j]  = h1_c @ W2_c[:, j] + b2_c[j]
             logit[:, j]    = h1_c @ W2_c[:, j] + h1_s @ W2_s[:, j] + (b2_c+b2_s)[j]

    The stage-1/2 contractions over the vocab axis run as a statically unrolled
    loop over the nv scratch tiles with static weight-block slices; all matmuls
    are bf16 x bf16 on the MXU with f32 accumulation, bias/ReLU stay in f32
    (v5e-friendly: no bf16 VPU work).
    """
    st = pl.program_id(1)
    j = pl.program_id(2)
    nv, bm, tv = logits_sc.shape

    @pl.when(st == 0)
    def _stage_lm_head():
        lg = jnp.dot(hid_ref[...], wlm_ref[...],
                     preferred_element_type=jnp.float32) + blm_ref[...]
        logits_sc[j] = lg.astype(jnp.bfloat16)

    @pl.when(st == 1)
    def _stage_fc1():
        acc_c = jnp.zeros((bm, tv), jnp.float32)
        acc_s = jnp.zeros((bm, tv), jnp.float32)
        for kk in range(nv):                       # static unroll over contraction tiles
            lb = logits_sc[kk]
            acc_c += jnp.dot(lb, w1c_ref[kk * tv:(kk + 1) * tv, :],
                             preferred_element_type=jnp.float32)
            acc_s += jnp.dot(lb, w1s_ref[kk * tv:(kk + 1) * tv, :],
                             preferred_element_type=jnp.float32)
        h1c_sc[j] = jnp.maximum(acc_c + b1c_ref[...], 0.0).astype(jnp.bfloat16)
        h1s_sc[j] = jnp.maximum(acc_s + b1s_ref[...], 0.0).astype(jnp.bfloat16)

    @pl.when(st == 2)
    def _stage_fc2():
        acc_c = jnp.zeros((bm, tv), jnp.float32)
        acc_s = jnp.zeros((bm, tv), jnp.float32)
        for kk in range(nv):
            acc_c += jnp.dot(h1c_sc[kk], w2c_ref[kk * tv:(kk + 1) * tv, :],
                             preferred_element_type=jnp.float32)
            acc_s += jnp.dot(h1s_sc[kk], w2s_ref[kk * tv:(kk + 1) * tv, :],
                             preferred_element_type=jnp.float32)
        # Accumulate both dots first, then one (pre-summed) bias add each.
        logitc_ref[...] = (acc_c + b2c_ref[...]).astype(logitc_ref.dtype)
        logit_ref[...] = (acc_c + acc_s + b2sum_ref[...]).astype(logit_ref.dtype)


# --------------------------------------------------------------------------
# Sizing helpers (generation-aware)
# --------------------------------------------------------------------------
def _vmem_capacity_bytes():
    try:
        return int(pltpu.get_tpu_info().vmem_capacity_bytes)
    except Exception:
        return 64 * 1024 * 1024            # conservative: v7x per-TC VMEM


def _default_tm():
    # v7x has 64 MiB/TensorCore -> smaller row tile; v5e/v6e (128 MiB) -> 256.
    return 128 if _vmem_capacity_bytes() <= 64 * 1024 * 1024 else 256


def _vmem_limit_bytes():
    return _vmem_capacity_bytes() * 3 // 4   # headroom for Mosaic internal scratch


def _row_tiling(M, tm):
    """Row tile (multiple of 8, padded to the bf16 sublane pack of 16) that
    yields >=2 row tiles when M allows it, so the 'parallel' row axis can be
    sharded across v7x's two TensorCores (no-op on v5e/v6e)."""
    m16 = _round_up(max(M, 8), 16)
    bm = min(tm, m16)
    if m16 // bm < 2 and M > 8:
        bm = max(8, _round_up(m16 // 2, 8))
    m_pad = _round_up(m16, bm)
    return bm, m_pad


def _vmem_estimate_bytes(bm, H, tv, nv, out_bytes):
    vp = nv * tv
    weights = 2 * 2 * (H * tv + 4 * vp * tv)      # bf16 weight blocks, double-buffered
    biases = 2 * 4 * 6 * tv                       # f32 bias tiles, double-buffered
    hidden = 2 * 2 * bm * H                       # bf16 row tile, double-buffered
    outs = 2 * 2 * bm * tv * out_bytes            # two outputs, double-buffered
    scratch = 3 * 2 * nv * bm * tv                # bf16 intermediates (logits, h1_c, h1_s)
    temps = 8 * 4 * bm * tv                       # in-kernel f32 accumulators / temps
    return weights + biases + hidden + outs + scratch + temps


# --------------------------------------------------------------------------
# One-time parameter preparation (outside the per-call path)
# --------------------------------------------------------------------------
def prepare_params(params, *, tv=256):
    """Pads every vocab dim to a lane-aligned multiple of the vocab tile,
    casts weights to bf16 (MXU inputs), keeps biases f32, and pre-sums
    b2_c + b2_s for the fused fc2 epilogue."""
    H, V = params["w_lm"].shape
    tv = _round_up(min(tv, _round_up(V, 128)), 128)
    Vp = _round_up(V, tv)
    pad = Vp - V

    def pad_last(x):
        return jnp.pad(x, ((0, 0), (0, pad))) if pad else x

    def pad_both(x):
        return jnp.pad(x, ((0, pad), (0, pad))) if pad else x

    prep = {
        "embedding": params["embedding"].astype(jnp.float32),
        "w_lm": pad_last(params["w_lm"]).astype(jnp.bfloat16),
        "b_lm": pad_last(params["b_lm"]).astype(jnp.float32),
        "w1_c": pad_both(params["w1_c"]).astype(jnp.bfloat16),
        "b1_c": pad_last(params["b1_c"]).astype(jnp.float32),
        "w1_s": pad_both(params["w1_s"]).astype(jnp.bfloat16),
        "b1_s": pad_last(params["b1_s"]).astype(jnp.float32),
        "w2_c": pad_both(params["w2_c"]).astype(jnp.bfloat16),
        "w2_s": pad_both(params["w2_s"]).astype(jnp.bfloat16),
        "b2_c": pad_last(params["b2_c"]).astype(jnp.float32),
        "b2_sum": pad_last(params["b2_c"] + params["b2_s"]).astype(jnp.float32),
    }
    meta = {"V": V, "Vp": Vp, "tv": tv, "H": H}
    return prep, meta


# --------------------------------------------------------------------------
# Forward wrapper
# --------------------------------------------------------------------------
def tispell_forward(input_ids, prep, meta, *, tm=None, out_dtype=jnp.bfloat16):
    """input_ids: (B, S) int32.  Returns (logit, logit_c), each (B, S, V)."""
    B, S = input_ids.shape
    V, Vp, tv, H = meta["V"], meta["Vp"], meta["tv"], meta["H"]
    nv = Vp // tv

    # Backbone glue (plain JAX): synthetic token-embedding lookup, bf16 MXU input.
    hidden = prep["embedding"][input_ids.reshape(-1)].astype(jnp.bfloat16)
    M = B * S

    if tm is None:
        tm = _default_tm()
    bm, m_pad = _row_tiling(M, tm)
    if m_pad != M:
        hidden = jnp.pad(hidden, ((0, m_pad - M), (0, 0)))

    out_bytes = jnp.dtype(out_dtype).itemsize
    limit = _vmem_limit_bytes()
    est = _vmem_estimate_bytes(bm, H, tv, nv, out_bytes)
    if est > limit:
        raise ValueError(
            f"VMEM estimate {est / 2**20:.1f} MiB exceeds budget "
            f"{limit / 2**20:.1f} MiB; reduce tm / vocab tile tv "
            "(or add contraction-axis tiling).")

    # Block index maps.  Weight blocks are clamped outside their own stage so
    # the pipeline's revisit elision fetches each (.., tv) weight column exactly
    # once per row tile; clamping to 0 before the stage doubles as early prefetch.
    def hid_map(i, st, j):
        return (i, 0)

    def lm_map(i, st, j):
        return (0, jnp.where(st == 0, j, nv - 1))

    def fc1_map(i, st, j):
        return (0, jnp.where(st == 1, j, jnp.where(st == 0, 0, nv - 1)))

    def fc2_map(i, st, j):
        return (0, jnp.where(st == 2, j, 0))

    def out_map(i, st, j):
        return (i, jnp.where(st == 2, j, 0))

    grid_spec = pltpu.PrefetchScalarGridSpec(
        num_scalar_prefetch=0,
        grid=(m_pad // bm, 3, nv),
        in_specs=[
            pl.BlockSpec((bm, H), hid_map),     # hidden row tile        (bf16)
            pl.BlockSpec((H, tv), lm_map),      # W_lm column tile       (bf16)
            pl.BlockSpec((1, tv), lm_map),      # b_lm tile              (f32)
            pl.BlockSpec((Vp, tv), fc1_map),    # W1_c column tile       (bf16)
            pl.BlockSpec((1, tv), fc1_map),     # b1_c tile
            pl.BlockSpec((Vp, tv), fc1_map),    # W1_s column tile
            pl.BlockSpec((1, tv), fc1_map),     # b1_s tile
            pl.BlockSpec((Vp, tv), fc2_map),    # W2_c column tile
            pl.BlockSpec((Vp, tv), fc2_map),    # W2_s column tile
            pl.BlockSpec((1, tv), fc2_map),     # b2_c tile
            pl.BlockSpec((1, tv), fc2_map),     # (b2_c + b2_s) tile
        ],
        out_specs=[
            pl.BlockSpec((bm, tv), out_map),    # logit
            pl.BlockSpec((bm, tv), out_map),    # logit_c
        ],
        scratch_shapes=[
            pltpu.VMEM((nv, bm, tv), jnp.bfloat16),   # logits (post-bias, bf16)
            pltpu.VMEM((nv, bm, tv), jnp.bfloat16),   # h1_c (post-ReLU, bf16)
            pltpu.VMEM((nv, bm, tv), jnp.bfloat16),   # h1_s (post-ReLU, bf16)
        ],
    )

    logit, logit_c = pl.pallas_call(
        tispell_kernel,
        out_shape=(jax.ShapeDtypeStruct((m_pad, Vp), out_dtype),
                   jax.ShapeDtypeStruct((m_pad, Vp), out_dtype)),
        grid_spec=grid_spec,
        compiler_params=pltpu.CompilerParams(
            dimension_semantics=("parallel", "arbitrary", "arbitrary"),
            vmem_limit_bytes=limit),
    )(hidden,
      prep["w_lm"], prep["b_lm"],
      prep["w1_c"], prep["b1_c"], prep["w1_s"], prep["b1_s"],
      prep["w2_c"], prep["w2_s"], prep["b2_c"], prep["b2_sum"])

    logit = logit[:M, :V].reshape(B, S, V)
    logit_c = logit_c[:M, :V].reshape(B, S, V)
    return logit, logit_c


# --------------------------------------------------------------------------
# Pure-JAX reference (identical mixed precision: bf16 MXU inputs, f32 accumulate)
# --------------------------------------------------------------------------
def reference_forward(input_ids, params):
    bf = jnp.bfloat16
    hidden = params["embedding"][input_ids].astype(bf)
    logits = jnp.dot(hidden, params["w_lm"].astype(bf),
                     preferred_element_type=jnp.float32) + params["b_lm"][0]
    lb = logits.astype(bf)
    hc = jnp.maximum(jnp.dot(lb, params["w1_c"].astype(bf),
                             preferred_element_type=jnp.float32)
                     + params["b1_c"][0], 0.0).astype(bf)
    hs = jnp.maximum(jnp.dot(lb, params["w1_s"].astype(bf),
                             preferred_element_type=jnp.float32)
                     + params["b1_s"][0], 0.0).astype(bf)
    logit_c = jnp.dot(hc, params["w2_c"].astype(bf),
                      preferred_element_type=jnp.float32) + params["b2_c"][0]
    logit_s = jnp.dot(hs, params["w2_s"].astype(bf),
                      preferred_element_type=jnp.float32) + params["b2_s"][0]
    return logit_c + logit_s, logit_c


def init_params(key, vocab, hidden):
    keys = jax.random.split(key, 11)

    def n(k, shape):
        return jax.random.normal(k, shape, jnp.float32) * 0.02

    return {
        "embedding": n(keys[0], (vocab, hidden)),
        "w_lm": n(keys[1], (hidden, vocab)),
        "b_lm": n(keys[2], (1, vocab)),
        # character_corrector = DownStreamer(vocab, vocab): fc1 V->V, fc2 V->V
        "w1_c": n(keys[3], (vocab, vocab)),
        "b1_c": n(keys[4], (1, vocab)),
        "w2_c": n(keys[5], (vocab, vocab)),
        "b2_c": n(keys[6], (1, vocab)),
        # syllable_corrector = DownStreamer(vocab, vocab)
        "w1_s": n(keys[7], (vocab, vocab)),
        "b1_s": n(keys[8], (1, vocab)),
        "w2_s": n(keys[9], (vocab, vocab)),
        "b2_s": n(keys[10], (1, vocab)),
    }


if __name__ == "__main__":
    # V deliberately NOT a multiple of 128 so the lane-alignment padding path is
    # exercised; tv=128 gives nv=2 vocab tiles and M=16 gives 2 row tiles, so
    # row tiling, the 3-stage pipeline and vocab tiling are all exercised.
    B, S, H, V = 2, 8, 32, 192
    key = jax.random.PRNGKey(0)
    k_params, k_ids = jax.random.split(key)
    params = init_params(k_params, V, H)
    input_ids = jax.random.randint(k_ids, (B, S), 0, V, dtype=jnp.int32)

    prep, meta = prepare_params(params, tv=128)          # one-time prep
    logit, logit_c = tispell_forward(input_ids, prep, meta)
    jax.block_until_ready((logit, logit_c))

    ref_logit, ref_logit_c = reference_forward(input_ids, params)
    assert logit.shape == (B, S, V) and logit_c.shape == (B, S, V)
    err1 = float(jnp.max(jnp.abs(logit.astype(jnp.float32) - ref_logit)))
    err2 = float(jnp.max(jnp.abs(logit_c.astype(jnp.float32) - ref_logit_c)))
    assert err1 < 5e-3 and err2 < 5e-3, (err1, err2)

    print("KERNEL_OK")
</pallas_src>

<mosaic_0001>
module attributes {stable_mosaic.version = 11 : i64} {
  func.func @tispell_kernel(%arg0: i32, %arg1: i32, %arg2: i32, %arg3: memref<8x32xbf16, #tpu.memory_space<vmem>>, %arg4: memref<32x128xbf16, #tpu.memory_space<vmem>>, %arg5: memref<1x128xf32, #tpu.memory_space<vmem>>, %arg6: memref<256x128xbf16, #tpu.memory_space<vmem>>, %arg7: memref<1x128xf32, #tpu.memory_space<vmem>>, %arg8: memref<256x128xbf16, #tpu.memory_space<vmem>>, %arg9: memref<1x128xf32, #tpu.memory_space<vmem>>, %arg10: memref<256x128xbf16, #tpu.memory_space<vmem>>, %arg11: memref<256x128xbf16, #tpu.memory_space<vmem>>, %arg12: memref<1x128xf32, #tpu.memory_space<vmem>>, %arg13: memref<1x128xf32, #tpu.memory_space<vmem>>, %arg14: memref<8x128xbf16, #tpu.memory_space<vmem>>, %arg15: memref<8x128xbf16, #tpu.memory_space<vmem>>, %arg16: memref<2x8x128xbf16, #tpu.memory_space<vmem>>, %arg17: memref<2x8x128xbf16, #tpu.memory_space<vmem>>, %arg18: memref<2x8x128xbf16, #tpu.memory_space<vmem>>) attributes {dimension_semantics = [#tpu.dimension_semantics<parallel>, #tpu.dimension_semantics<arbitrary>, #tpu.dimension_semantics<arbitrary>], iteration_bounds = array<i64: 2, 3, 2>, scalar_prefetch = 0 : i64, scratch_operands = 3 : i64, tpu.core_type = #tpu.core_type<tc>, window_params = [{transform_indices = @transform_0, window_bounds = array<i64: 8, 32>}, {transform_indices = @transform_1, window_bounds = array<i64: 32, 128>}, {transform_indices = @transform_2, window_bounds = array<i64: 1, 128>}, {transform_indices = @transform_3, window_bounds = array<i64: 256, 128>}, {transform_indices = @transform_4, window_bounds = array<i64: 1, 128>}, {transform_indices = @transform_5, window_bounds = array<i64: 256, 128>}, {transform_indices = @transform_6, window_bounds = array<i64: 1, 128>}, {transform_indices = @transform_7, window_bounds = array<i64: 256, 128>}, {transform_indices = @transform_8, window_bounds = array<i64: 256, 128>}, {transform_indices = @transform_9, window_bounds = array<i64: 1, 128>}, {transform_indices = @transform_10, window_bounds = array<i64: 1, 128>}, {transform_indices = @transform_11, window_bounds = array<i64: 8, 128>}, {transform_indices = @transform_12, window_bounds = array<i64: 8, 128>}]} {
    %c0_i32 = arith.constant 0 : i32
    %0 = arith.cmpi eq, %arg1, %c0_i32 : i32
    %1 = arith.extui %0 : i1 to i32
    %c0_i32_0 = arith.constant 0 : i32
    %2 = arith.cmpi ne, %1, %c0_i32_0 : i32
    scf.if %2 {
      %c0 = arith.constant 0 : index
      %c0_3 = arith.constant 0 : index
      %9 = vector.load %arg3[%c0, %c0_3] : memref<8x32xbf16, #tpu.memory_space<vmem>>, vector<8x32xbf16>
      %c0_4 = arith.constant 0 : index
      %c0_5 = arith.constant 0 : index
      %10 = vector.load %arg4[%c0_4, %c0_5] : memref<32x128xbf16, #tpu.memory_space<vmem>>, vector<32x128xbf16>
      %cst = arith.constant dense<0.000000e+00> : vector<8x128xf32>
      %11 = tpu.matmul %9, %10, %cst {dimension_numbers = #tpu.dot_dimension_numbers<[1], [0], [0], [1], [0, 0, 1, 1], [], []>} : vector<8x32xbf16>, vector<32x128xbf16>, vector<8x128xf32> -> vector<8x128xf32>
      %c0_6 = arith.constant 0 : index
      %c0_7 = arith.constant 0 : index
      %12 = vector.load %arg5[%c0_6, %c0_7] : memref<1x128xf32, #tpu.memory_space<vmem>>, vector<1x128xf32>
      %13 = vector.broadcast %12 : vector<1x128xf32> to vector<8x128xf32>
      %14 = arith.addf %11, %13 : vector<8x128xf32>
      %15 = arith.truncf %14 : vector<8x128xf32> to vector<8x128xbf16>
      %16 = arith.index_cast %arg2 : i32 to index
      %c0_8 = arith.constant 0 : index
      %c0_9 = arith.constant 0 : index
      %17 = vector.load %arg16[%16, %c0_8, %c0_9] : memref<2x8x128xbf16, #tpu.memory_space<vmem>>, vector<1x8x128xbf16>
      %18 = vector.shape_cast %17 : vector<1x8x128xbf16> to vector<8x128xbf16>
      %19 = vector.shape_cast %15 : vector<8x128xbf16> to vector<1x8x128xbf16>
      tpu.vector_store %arg16[%16, %c0_8, %c0_9], %19 {strides = array<i32>} : memref<2x8x128xbf16, #tpu.memory_space<vmem>>, vector<1x8x128xbf16>,
    } else {
    }
    %c1_i32 = arith.constant 1 : i32
    %3 = arith.cmpi eq, %arg1, %c1_i32 : i32
    %4 = arith.extui %3 : i1 to i32
    %c0_i32_1 = arith.constant 0 : i32
    %5 = arith.cmpi ne, %4, %c0_i32_1 : i32
    scf.if %5 {
      %cst = arith.constant 0.000000e+00 : f32
      %9 = vector.broadcast %cst : f32 to vector<8x128xf32>
      %cst_3 = arith.constant 0.000000e+00 : f32
      %10 = vector.broadcast %cst_3 : f32 to vector<8x128xf32>
      %c0 = arith.constant 0 : index
      %c0_4 = arith.constant 0 : index
      %c0_5 = arith.constant 0 : index
      %11 = vector.load %arg16[%c0, %c0_4, %c0_5] : memref<2x8x128xbf16, #tpu.memory_space<vmem>>, vector<1x8x128xbf16>
      %12 = vector.shape_cast %11 : vector<1x8x128xbf16> to vector<8x128xbf16>
      %c0_6 = arith.constant 0 : index
      %c0_7 = arith.constant 0 : index
      %13 = vector.load %arg6[%c0_6, %c0_7] : memref<256x128xbf16, #tpu.memory_space<vmem>>, vector<128x128xbf16>
      %cst_8 = arith.constant dense<0.000000e+00> : vector<8x128xf32>
      %14 = tpu.matmul %12, %13, %cst_8 {dimension_numbers = #tpu.dot_dimension_numbers<[1], [0], [0], [1], [0, 0, 1, 1], [], []>} : vector<8x128xbf16>, vector<128x128xbf16>, vector<8x128xf32> -> vector<8x128xf32>
      %15 = arith.addf %9, %14 : vector<8x128xf32>
      %c0_9 = arith.constant 0 : index
      %c0_10 = arith.constant 0 : index
      %16 = vector.load %arg8[%c0_9, %c0_10] : memref<256x128xbf16, #tpu.memory_space<vmem>>, vector<128x128xbf16>
      %cst_11 = arith.constant dense<0.000000e+00> : vector<8x128xf32>
      %17 = tpu.matmul %12, %16, %cst_11 {dimension_numbers = #tpu.dot_dimension_numbers<[1], [0], [0], [1], [0, 0, 1, 1], [], []>} : vector<8x128xbf16>, vector<128x128xbf16>, vector<8x128xf32> -> vector<8x128xf32>
      %18 = arith.addf %10, %17 : vector<8x128xf32>
      %c1 = arith.constant 1 : index
      %c0_12 = arith.constant 0 : index
      %c0_13 = arith.constant 0 : index
      %19 = vector.load %arg16[%c1, %c0_12, %c0_13] : memref<2x8x128xbf16, #tpu.memory_space<vmem>>, vector<1x8x128xbf16>
      %20 = vector.shape_cast %19 : vector<1x8x128xbf16> to vector<8x128xbf16>
      %c128 = arith.constant 128 : index
      %c0_14 = arith.constant 0 : index
      %21 = vector.load %arg6[%c128, %c0_14] : memref<256x128xbf16, #tpu.memory_space<vmem>>, vector<128x128xbf16>
      %cst_15 = arith.constant dense<0.000000e+00> : vector<8x128xf32>
      %22 = tpu.matmul %20, %21, %cst_15 {dimension_numbers = #tpu.dot_dimension_numbers<[1], [0], [0], [1], [0, 0, 1, 1], [], []>} : vector<8x128xbf16>, vector<128x128xbf16>, vector<8x128xf32> -> vector<8x128xf32>
      %23 = arith.addf %15, %22 : vector<8x128xf32>
      %c128_16 = arith.constant 128 : index
      %c0_17 = arith.constant 0 : index
      %24 = vector.load %arg8[%c128_16, %c0_17] : memref<256x128xbf16, #tpu.memory_space<vmem>>, vector<128x128xbf16>
      %cst_18 = arith.constant dense<0.000000e+00> : vector<8x128xf32>
      %25 = tpu.matmul %20, %24, %cst_18 {dimension_numbers = #tpu.dot_dimension_numbers<[1], [0], [0], [1], [0, 0, 1, 1], [], []>} : vector<8x128xbf16>, vector<128x128xbf16>, vector<8x128xf32> -> vector<8x128xf32>
      %26 = arith.addf %18, %25 : vector<8x128xf32>
      %c0_19 = arith.constant 0 : index
      %c0_20 = arith.constant 0 : index
      %27 = vector.load %arg7[%c0_19, %c0_20] : memref<1x128xf32, #tpu.memory_space<vmem>>, vector<1x128xf32>
      %28 = vector.broadcast %27 : vector<1x128xf32> to vector<8x128xf32>
      %29 = arith.addf %23, %28 : vector<8x128xf32>
      %cst_21 = arith.constant 0.000000e+00 : f32
      %30 = vector.broadcast %cst_21 : f32 to vector<8x128xf32>
      %31 = arith.maximumf %29, %30 : vector<8x128xf32>
      %32 = arith.truncf %31 : vector<8x128xf32> to vector<8x128xbf16>
      %33 = arith.index_cast %arg2 : i32 to index
      %c0_22 = arith.constant 0 : index
      %c0_23 = arith.constant 0 : index
      %34 = vector.load %arg17[%33, %c0_22, %c0_23] : memref<2x8x128xbf16, #tpu.memory_space<vmem>>, vector<1x8x128xbf16>
      %35 = vector.shape_cast %34 : vector<1x8x128xbf16> to vector<8x128xbf16>
      %36 = vector.shape_cast %32 : vector<8x128xbf16> to vector<1x8x128xbf16>
      tpu.vector_store %arg17[%33, %c0_22, %c0_23], %36 {strides = array<i32>} : memref<2x8x128xbf16, #tpu.memory_space<vmem>>, vector<1x8x128xbf16>,
      %c0_24 = arith.constant 0 : index
      %c0_25 = arith.constant 0 : index
      %37 = vector.load %arg9[%c0_24, %c0_25] : memref<1x128xf32, #tpu.memory_space<vmem>>, vector<1x128xf32>
      %38 = vector.broadcast %37 : vector<1x128xf32> to vector<8x128xf32>
      %39 = arith.addf %26, %38 : vector<8x128xf32>
      %cst_26 = arith.constant 0.000000e+00 : f32
      %40 = vector.broadcast %cst_26 : f32 to vector<8x128xf32>
      %41 = arith.maximumf %39, %40 : vector<8x128xf32>
      %42 = arith.truncf %41 : vector<8x128xf32> to vector<8x128xbf16>
      %43 = arith.index_cast %arg2 : i32 to index
      %c0_27 = arith.constant 0 : index
      %c0_28 = arith.constant 0 : index
      %44 = vector.load %arg18[%43, %c0_27, %c0_28] : memref<2x8x128xbf16, #tpu.memory_space<vmem>>, vector<1x8x128xbf16>
      %45 = vector.shape_cast %44 : vector<1x8x128xbf16> to vector<8x128xbf16>
      %46 = vector.shape_cast %42 : vector<8x128xbf16> to vector<1x8x128xbf16>
      tpu.vector_store %arg18[%43, %c0_27, %c0_28], %46 {strides = array<i32>} : memref<2x8x128xbf16, #tpu.memory_space<vmem>>, vector<1x8x128xbf16>,
    } else {
    }
    %c2_i32 = arith.constant 2 : i32
    %6 = arith.cmpi eq, %arg1, %c2_i32 : i32
    %7 = arith.extui %6 : i1 to i32
    %c0_i32_2 = arith.constant 0 : i32
    %8 = arith.cmpi ne, %7, %c0_i32_2 : i32
    scf.if %8 {
      %cst = arith.constant 0.000000e+00 : f32
      %9 = vector.broadcast %cst : f32 to vector<8x128xf32>
      %cst_3 = arith.constant 0.000000e+00 : f32
      %10 = vector.broadcast %cst_3 : f32 to vector<8x128xf32>
      %c0 = arith.constant 0 : index
      %c0_4 = arith.constant 0 : index
      %c0_5 = arith.constant 0 : index
      %11 = vector.load %arg17[%c0, %c0_4, %c0_5] : memref<2x8x128xbf16, #tpu.memory_space<vmem>>, vector<1x8x128xbf16>
      %12 = vector.shape_cast %11 : vector<1x8x128xbf16> to vector<8x128xbf16>
      %c0_6 = arith.constant 0 : index
      %c0_7 = arith.constant 0 : index
      %13 = vector.load %arg10[%c0_6, %c0_7] : memref<256x128xbf16, #tpu.memory_space<vmem>>, vector<128x128xbf16>
      %cst_8 = arith.constant dense<0.000000e+00> : vector<8x128xf32>
      %14 = tpu.matmul %12, %13, %cst_8 {dimension_numbers = #tpu.dot_dimension_numbers<[1], [0], [0], [1], [0, 0, 1, 1], [], []>} : vector<8x128xbf16>, vector<128x128xbf16>, vector<8x128xf32> -> vector<8x128xf32>
      %15 = arith.addf %9, %14 : vector<8x128xf32>
      %c0_9 = arith.constant 0 : index
      %c0_10 = arith.constant 0 : index
      %c0_11 = arith.constant 0 : index
      %16 = vector.load %arg18[%c0_9, %c0_10, %c0_11] : memref<2x8x128xbf16, #tpu.memory_space<vmem>>, vector<1x8x128xbf16>
      %17 = vector.shape_cast %16 : vector<1x8x128xbf16> to vector<8x128xbf16>
      %c0_12 = arith.constant 0 : index
      %c0_13 = arith.constant 0 : index
      %18 = vector.load %arg11[%c0_12, %c0_13] : memref<256x128xbf16, #tpu.memory_space<vmem>>, vector<128x128xbf16>
      %cst_14 = arith.constant dense<0.000000e+00> : vector<8x128xf32>
      %19 = tpu.matmul %17, %18, %cst_14 {dimension_numbers = #tpu.dot_dimension_numbers<[1], [0], [0], [1], [0, 0, 1, 1], [], []>} : vector<8x128xbf16>, vector<128x128xbf16>, vector<8x128xf32> -> vector<8x128xf32>
      %20 = arith.addf %10, %19 : vector<8x128xf32>
      %c1 = arith.constant 1 : index
      %c0_15 = arith.constant 0 : index
      %c0_16 = arith.constant 0 : index
      %21 = vector.load %arg17[%c1, %c0_15, %c0_16] : memref<2x8x128xbf16, #tpu.memory_space<vmem>>, vector<1x8x128xbf16>
      %22 = vector.shape_cast %21 : vector<1x8x128xbf16> to vector<8x128xbf16>
      %c128 = arith.constant 128 : index
      %c0_17 = arith.constant 0 : index
      %23 = vector.load %arg10[%c128, %c0_17] : memref<256x128xbf16, #tpu.memory_space<vmem>>, vector<128x128xbf16>
      %cst_18 = arith.constant dense<0.000000e+00> : vector<8x128xf32>
      %24 = tpu.matmul %22, %23, %cst_18 {dimension_numbers = #tpu.dot_dimension_numbers<[1], [0], [0], [1], [0, 0, 1, 1], [], []>} : vector<8x128xbf16>, vector<128x128xbf16>, vector<8x128xf32> -> vector<8x128xf32>
      %25 = arith.addf %15, %24 : vector<8x128xf32>
      %c1_19 = arith.constant 1 : index
      %c0_20 = arith.constant 0 : index
      %c0_21 = arith.constant 0 : index
      %26 = vector.load %arg18[%c1_19, %c0_20, %c0_21] : memref<2x8x128xbf16, #tpu.memory_space<vmem>>, vector<1x8x128xbf16>
      %27 = vector.shape_cast %26 : vector<1x8x128xbf16> to vector<8x128xbf16>
      %c128_22 = arith.constant 128 : index
      %c0_23 = arith.constant 0 : index
      %28 = vector.load %arg11[%c128_22, %c0_23] : memref<256x128xbf16, #tpu.memory_space<vmem>>, vector<128x128xbf16>
      %cst_24 = arith.constant dense<0.000000e+00> : vector<8x128xf32>
      %29 = tpu.matmul %27, %28, %cst_24 {dimension_numbers = #tpu.dot_dimension_numbers<[1], [0], [0], [1], [0, 0, 1, 1], [], []>} : vector<8x128xbf16>, vector<128x128xbf16>, vector<8x128xf32> -> vector<8x128xf32>
      %30 = arith.addf %20, %29 : vector<8x128xf32>
      %c0_25 = arith.constant 0 : index
      %c0_26 = arith.constant 0 : index
      %31 = vector.load %arg12[%c0_25, %c0_26] : memref<1x128xf32, #tpu.memory_space<vmem>>, vector<1x128xf32>
      %32 = vector.broadcast %31 : vector<1x128xf32> to vector<8x128xf32>
      %33 = arith.addf %25, %32 : vector<8x128xf32>
      %34 = arith.truncf %33 : vector<8x128xf32> to vector<8x128xbf16>
      %c0_27 = arith.constant 0 : index
      %c0_28 = arith.constant 0 : index
      %35 = vector.load %arg15[%c0_27, %c0_28] : memref<8x128xbf16, #tpu.memory_space<vmem>>, vector<8x128xbf16>
      tpu.vector_store %arg15[%c0_27, %c0_28], %34 {strides = array<i32>} : memref<8x128xbf16, #tpu.memory_space<vmem>>, vector<8x128xbf16>,
      %36 = arith.addf %25, %30 : vector<8x128xf32>
      %c0_29 = arith.constant 0 : index
      %c0_30 = arith.constant 0 : index
      %37 = vector.load %arg13[%c0_29, %c0_30] : memref<1x128xf32, #tpu.memory_space<vmem>>, vector<1x128xf32>
      %38 = vector.broadcast %37 : vector<1x128xf32> to vector<8x128xf32>
      %39 = arith.addf %36, %38 : vector<8x128xf32>
      %40 = arith.truncf %39 : vector<8x128xf32> to vector<8x128xbf16>
      %c0_31 = arith.constant 0 : index
      %c0_32 = arith.constant 0 : index
      %41 = vector.load %arg14[%c0_31, %c0_32] : memref<8x128xbf16, #tpu.memory_space<vmem>>, vector<8x128xbf16>
      tpu.vector_store %arg14[%c0_31, %c0_32], %40 {strides = array<i32>} : memref<8x128xbf16, #tpu.memory_space<vmem>>, vector<8x128xbf16>,
    } else {
    }
    return
  }
  func.func @transform_0(%arg0: i32, %arg1: i32, %arg2: i32) -> (i32, i32) {
    %c0_i32 = arith.constant 0 : i32
    %c0_i32_0 = arith.constant 0 : i32
    return %arg0, %c0_i32 : i32, i32
  }
  func.func @transform_1(%arg0: i32, %arg1: i32, %arg2: i32) -> (i32, i32) {
    %c0_i32 = arith.constant 0 : i32
    %0 = arith.cmpi eq, %arg1, %c0_i32 : i32
    %c1_i32 = arith.constant 1 : i32
    %1 = arith.select %0, %arg2, %c1_i32 : i32
    %c0_i32_0 = arith.constant 0 : i32
    %c0_i32_1 = arith.constant 0 : i32
    return %c0_i32_0, %1 : i32, i32
  }
  func.func @transform_2(%arg0: i32, %arg1: i32, %arg2: i32) -> (i32, i32) {
    %c0_i32 = arith.constant 0 : i32
    %0 = arith.cmpi eq, %arg1, %c0_i32 : i32
    %c1_i32 = arith.constant 1 : i32
    %1 = arith.select %0, %arg2, %c1_i32 : i32
    %c0_i32_0 = arith.constant 0 : i32
    %c0_i32_1 = arith.constant 0 : i32
    return %c0_i32_0, %1 : i32, i32
  }
  func.func @transform_3(%arg0: i32, %arg1: i32, %arg2: i32) -> (i32, i32) {
    %c1_i32 = arith.constant 1 : i32
    %0 = arith.cmpi eq, %arg1, %c1_i32 : i32
    %c0_i32 = arith.constant 0 : i32
    %1 = arith.cmpi eq, %arg1, %c0_i32 : i32
    %c0_i32_0 = arith.constant 0 : i32
    %c1_i32_1 = arith.constant 1 : i32
    %2 = arith.select %1, %c0_i32_0, %c1_i32_1 : i32
    %3 = arith.select %0, %arg2, %2 : i32
    %c0_i32_2 = arith.constant 0 : i32
    %c0_i32_3 = arith.constant 0 : i32
    return %c0_i32_2, %3 : i32, i32
  }
  func.func @transform_4(%arg0: i32, %arg1: i32, %arg2: i32) -> (i32, i32) {
    %c1_i32 = arith.constant 1 : i32
    %0 = arith.cmpi eq, %arg1, %c1_i32 : i32
    %c0_i32 = arith.constant 0 : i32
    %1 = arith.cmpi eq, %arg1, %c0_i32 : i32
    %c0_i32_0 = arith.constant 0 : i32
    %c1_i32_1 = arith.constant 1 : i32
    %2 = arith.select %1, %c0_i32_0, %c1_i32_1 : i32
    %3 = arith.select %0, %arg2, %2 : i32
    %c0_i32_2 = arith.constant 0 : i32
    %c0_i32_3 = arith.constant 0 : i32
    return %c0_i32_2, %3 : i32, i32
  }
  func.func @transform_5(%arg0: i32, %arg1: i32, %arg2: i32) -> (i32, i32) {
    %c1_i32 = arith.constant 1 : i32
    %0 = arith.cmpi eq, %arg1, %c1_i32 : i32
    %c0_i32 = arith.constant 0 : i32
    %1 = arith.cmpi eq, %arg1, %c0_i32 : i32
    %c0_i32_0 = arith.constant 0 : i32
    %c1_i32_1 = arith.constant 1 : i32
    %2 = arith.select %1, %c0_i32_0, %c1_i32_1 : i32
    %3 = arith.select %0, %arg2, %2 : i32
    %c0_i32_2 = arith.constant 0 : i32
    %c0_i32_3 = arith.constant 0 : i32
    return %c0_i32_2, %3 : i32, i32
  }
  func.func @transform_6(%arg0: i32, %arg1: i32, %arg2: i32) -> (i32, i32) {
    %c1_i32 = arith.constant 1 : i32
    %0 = arith.cmpi eq, %arg1, %c1_i32 : i32
    %c0_i32 = arith.constant 0 : i32
    %1 = arith.cmpi eq, %arg1, %c0_i32 : i32
    %c0_i32_0 = arith.constant 0 : i32
    %c1_i32_1 = arith.constant 1 : i32
    %2 = arith.select %1, %c0_i32_0, %c1_i32_1 : i32
    %3 = arith.select %0, %arg2, %2 : i32
    %c0_i32_2 = arith.constant 0 : i32
    %c0_i32_3 = arith.constant 0 : i32
    return %c0_i32_2, %3 : i32, i32
  }
  func.func @transform_7(%arg0: i32, %arg1: i32, %arg2: i32) -> (i32, i32) {
    %c2_i32 = arith.constant 2 : i32
    %0 = arith.cmpi eq, %arg1, %c2_i32 : i32
    %c0_i32 = arith.constant 0 : i32
    %1 = arith.select %0, %arg2, %c0_i32 : i32
    %c0_i32_0 = arith.constant 0 : i32
    %c0_i32_1 = arith.constant 0 : i32
    return %c0_i32_0, %1 : i32, i32
  }
  func.func @transform_8(%arg0: i32, %arg1: i32, %arg2: i32) -> (i32, i32) {
    %c2_i32 = arith.constant 2 : i32
    %0 = arith.cmpi eq, %arg1, %c2_i32 : i32
    %c0_i32 = arith.constant 0 : i32
    %1 = arith.select %0, %arg2, %c0_i32 : i32
    %c0_i32_0 = arith.constant 0 : i32
    %c0_i32_1 = arith.constant 0 : i32
    return %c0_i32_0, %1 : i32, i32
  }
  func.func @transform_9(%arg0: i32, %arg1: i32, %arg2: i32) -> (i32, i32) {
    %c2_i32 = arith.constant 2 : i32
    %0 = arith.cmpi eq, %arg1, %c2_i32 : i32
    %c0_i32 = arith.constant 0 : i32
    %1 = arith.select %0, %arg2, %c0_i32 : i32
    %c0_i32_0 = arith.constant 0 : i32
    %c0_i32_1 = arith.constant 0 : i32
    return %c0_i32_0, %1 : i32, i32
  }
  func.func @transform_10(%arg0: i32, %arg1: i32, %arg2: i32) -> (i32, i32) {
    %c2_i32 = arith.constant 2 : i32
    %0 = arith.cmpi eq, %arg1, %c2_i32 : i32
    %c0_i32 = arith.constant 0 : i32
    %1 = arith.select %0, %arg2, %c0_i32 : i32
    %c0_i32_0 = arith.constant 0 : i32
    %c0_i32_1 = arith.constant 0 : i32
    return %c0_i32_0, %1 : i32, i32
  }
  func.func @transform_11(%arg0: i32, %arg1: i32, %arg2: i32) -> (i32, i32) {
    %c2_i32 = arith.constant 2 : i32
    %0 = arith.cmpi eq, %arg1, %c2_i32 : i32
    %c0_i32 = arith.constant 0 : i32
    %1 = arith.select %0, %arg2, %c0_i32 : i32
    %c0_i32_0 = arith.constant 0 : i32
    return %arg0, %1 : i32, i32
  }
  func.func @transform_12(%arg0: i32, %arg1: i32, %arg2: i32) -> (i32, i32) {
    %c2_i32 = arith.constant 2 : i32
    %0 = arith.cmpi eq, %arg1, %c2_i32 : i32
    %c0_i32 = arith.constant 0 : i32
    %1 = arith.select %0, %arg2, %c0_i32 : i32
    %c0_i32_0 = arith.constant 0 : i32
    return %arg0, %1 : i32, i32
  }
}

</mosaic_0001>

<bundles_post_ra>
// kernel: tpu_custom_call.1
= control target key start
LH: loop header
LB: loop body
LE: loop exit
PB: predicated region body
PF: predicated region fallthrough
CT: control target
= control target key end

     0   :  { %s3772_s0 = inlined_call_operand.hbm [shape: bf16[16,32], index: 0, kind: input, shape index: {}]   ;;  %s3773_s1 = inlined_call_operand.hbm [shape: bf16[32,256], index: 1, kind: input, shape index: {}]   ;;  %s3774_s2 = inlined_call_operand.hbm [shape: f32[1,256], index: 2, kind: input, shape index: {}]   ;;  %s3775_s3 = inlined_call_operand.hbm [shape: bf16[256,256], index: 3, kind: input, shape index: {}]   ;;  %s3776_s4 = inlined_call_operand.vmem [shape: f32[1,256], index: 4, kind: input, shape index: {}]   ;;  %s3777_s5 = inlined_call_operand.hbm [shape: bf16[256,256], index: 5, kind: input, shape index: {}]   ;;  %s3778_s6 = inlined_call_operand.vmem [shape: f32[1,256], index: 6, kind: input, shape index: {}]   ;;  %s3779_s7 = inlined_call_operand.hbm [shape: bf16[256,256], index: 7, kind: input, shape index: {}]   ;;  %s3780_s8 = inlined_call_operand.hbm [shape: bf16[256,256], index: 8, kind: input, shape index: {}]   ;;  %s3781_s9 = inlined_call_operand.vmem [shape: f32[1,256], index: 9, kind: input, shape index: {}]   ;;  %s3782_s10 = inlined_call_operand.vmem [shape: f32[1,256], index: 10, kind: input, shape index: {}]   ;;  %s3783_s11 = inlined_call_operand.hbm [shape: bf16[16,256], index: 11, kind: output, shape index: {0}]   ;;  %s3784_s12 = inlined_call_operand.hbm [shape: bf16[16,256], index: 12, kind: output, shape index: {1}]  }
   0x1   :  { %3844 = sst [smem:[#allocation64_spill]] %s3772_s0 }
   0x2   :  { %3845 = sst [smem:[#allocation65_spill]] %s3773_s1 }
   0x3   :  { %3846 = sst [smem:[#allocation66_spill]] %s3774_s2 }
   0x4   :  { %3847 = sst [smem:[#allocation67_spill]] %s3775_s3 }
   0x5   :  { %3848 = sst [smem:[#allocation68_spill]] %s3776_s4 }
   0x6   :  { %3849 = sst [smem:[#allocation69_spill]] %s3777_s5 }
   0x7   :  { %3850 = sst [smem:[#allocation70_spill]] %s3778_s6 }
   0x8   :  { %3851 = sst [smem:[#allocation71_spill]] %s3779_s7 }
   0x9   :  { %3852 = sst [smem:[#allocation72_spill]] %s3780_s8 }
   0xa   :  { %3853 = sst [smem:[#allocation73_spill]] %s3781_s9 }
   0xb   :  { %3854 = sst [smem:[#allocation74_spill]] %s3782_s10 }
   0xc   :  { %3855 = sst [smem:[#allocation75_spill]] %s3783_s11 }
   0xd   :  { %3856 = sst [smem:[#allocation76_spill]] %s3784_s12 }
   0xe   :  { %18 = vsyncpa [#allocation6], 0 }
   0xf   :  { %20 = vsyncpa [#allocation6 + $0x1], 0 }
  0x10   :  { %21 = vsyncpa [#allocation9], 0 }
  0x11   :  { %23 = vsyncpa [#allocation9 + $0x1], 0 }
  0x12   :  { %24 = vsyncpa [#allocation12], 0 }
  0x13   :  { %26 = vsyncpa [#allocation12 + $0x1], 0 }
  0x14   :  { %27 = vsyncpa [#allocation15], 0 }
  0x15   :  { %29 = vsyncpa [#allocation15 + $0x1], 0 }
  0x16   :  { %30 = vsyncpa [#allocation7], 0 }
  0x17   :  { %32 = vsyncpa [#allocation7 + $0x1], 0 }
  0x18   :  { %33 = vsyncpa [#allocation19], 0 }
  0x19   :  { %35 = vsyncpa [#allocation19 + $0x1], 0  ;;  %s3098_s21 = smov 0   ;;  %s3100_s22 = smov 0  }
  0x1a   :  { %s3102_s23 = smov 0   ;;  %s3104_s24 = smov 0  }
  0x1b   :  { %s3106_s25 = smov 0   ;;  %s3108_s26 = smov 0  }
  0x1c   :  { %s3110_s27 = smov 0   ;;  %s3112_s28 = smov 0  }
  0x1d   :  { %s3114_s29 = smov 0   ;;  %s3116_s30 = smov 0  }
  0x1e   :  { %s3118_s13 = smov 0   ;;  %s3120_s14 = smov 0  }
  0x1f   :  { %s3122_s15 = smov 0   ;;  %s3124_s16 = smov 0  }
  0x20   :  { %s3126_s17 = smov 0   ;;  %s3128_s18 = smov 0  }
  0x21   :  { %s3130_s19 = smov 0   ;;  %s3132_s20 = smov 0  }
  0x22   :  { %s3134_s12 = smov 0   ;;  %s3136_s11 = smov 0  }
  0x23   :  { %s3138_s6 = smov 0   ;;  %s3140_s4 = smov 0  }
  0x24 LB: > { %3857 = sst [smem:[#allocation26_spill]] %s2944_s21  ;;  %p75_p0 = scmp.eq.s32.totalorder %s3028_s4, 0  ;;  %s3028_s4 = sphi %s3140_s4, %s41_s4   ;;  %s3024_s6 = sphi %s3138_s6, %s4014_s6   ;;  %s3020_s11 = sphi %s3136_s11, %s4013_s11   ;;  %s3016_s12 = sphi %s3134_s12, %s4012_s12   ;;  %s3012_s20 = sphi %s3132_s20, %s4011_s20   ;;  %s3008_s19 = sphi %s3130_s19, %s4010_s19   ;;  %s3004_s18 = sphi %s3128_s18, %s4009_s18   ;;  %s3000_s17 = sphi %s3126_s17, %s4008_s17   ;;  %s2996_s16 = sphi %s3124_s16, %s4007_s16   ;;  %s2992_s15 = sphi %s3122_s15, %s4006_s15   ;;  %s2988_s14 = sphi %s3120_s14, %s4005_s14   ;;  %s2984_s13 = sphi %s3118_s13, %s4004_s13   ;;  %s2980_s30 = sphi %s3116_s30, %s4003_s30   ;;  %s2976_s29 = sphi %s3114_s29, %s4002_s29   ;;  %s2972_s28 = sphi %s3112_s28, %s4001_s28   ;;  %s2968_s27 = sphi %s3110_s27, %s4000_s27   ;;  %s2964_s26 = sphi %s3108_s26, %s3999_s26   ;;  %s2960_s25 = sphi %s3106_s25, %s3998_s25   ;;  %s2956_s24 = sphi %s3104_s24, %s3997_s24   ;;  %s2952_s23 = sphi %s3102_s23, %s3996_s23   ;;  %s2948_s22 = sphi %s3100_s22, %s3995_s22   ;;  %s2944_s21 = sphi %s3098_s21, %s3994_s21  }
  0x25   : > { %3858 = sst [smem:[#allocation27_spill]] %s2948_s22  ;;  %p90_p1 = scmp.eq.s32.totalorder %s3020_s11, 0 }
  0x26   : > { %3859 = sst [smem:[#allocation28_spill]] %s2952_s23  ;;  %p104_p2 = scmp.ne.s32.totalorder %s2988_s14, %s2984_s13 }
  0x27   : > { %3860 = sst [smem:[#allocation29_spill]] %s2960_s25  ;;  %p110_p4 = scmp.ne.s32.totalorder %s2984_s13, %s2980_s30 }
  0x28   : > { %3861 = sst [smem:[#allocation30_spill]] %s2964_s26  ;;  %p3218_p3 = por %p104_p2, %p75_p0 }
  0x29   : > { %3862 = sst [smem:[#allocation31_spill]] %s2968_s27  ;;  %p3815_p5 = scmp.lt.s32.totalorder %s3028_s4, 12 }
  0x2a   : > { %3863 = sst [smem:[#allocation32_spill]] %s2972_s28  ;;  %s3799_s21 = smov 4  }
  0x2b   : > { %3864 = sst [smem:[#allocation33_spill]] %s2976_s29  ;;  %p3239_p6 = pnand %p3815_p5, %p3218_p3 }
  0x2c   : > { %3865 = sst [smem:[#allocation34_spill]] %s2980_s30  ;;  %p1977_p7 = scmp.ge.s32.totalorder %s3028_s4, 1 }
  0x2d   : > { %3866 = sst [smem:[#allocation35_spill]] %s2984_s13  ;;  %p687_p8 = scmp.lt.s32.totalorder %s3028_s4, 13 }
  0x2e   : > { %3867 = sst [smem:[#allocation36_spill]] %s2988_s14  ;;  %p150_p10 = scmp.eq.s32.totalorder %s3020_s11, 1 }
  0x2f   : > { %3868 = sst [smem:[#allocation37_spill]] %s2996_s16  ;;  %p3253_p9 = pnand %p1977_p7, %p687_p8 }
  0x30   : > { %3869 = sst [smem:[#allocation38_spill]] %s3000_s17  ;;  %p151_p11 = scmp.ne.s32.totalorder %s3020_s11, 0 }
  0x31   : > { %3870 = sst [smem:[#allocation39_spill]] %s3004_s18  ;;  %s3226_s18 = sand.u32 1, %s3028_s4  }
  0x32   : > { %3871 = sst [smem:[#allocation40_spill]] %s3008_s19  ;;  %s3793_s19 = sand.u32 1, %s2988_s14  }
  0x33   : > { %3872 = sst [smem:[#allocation41_spill]] %s3012_s20  ;;  %s1967_s10 = sshll.u32 %s3793_s19, 4 }
  0x34   : > { %3873 = sst [smem:[#allocation42_spill]] %s3016_s12  ;;  %s507_s23 = scalar_lea.vmem [#allocation8], %s1967_s10 }
  0x35   : > { %3874 = sst [smem:[#allocation43_spill]] %s3020_s11  ;;  %s516_s30 = sshll.u32 %s507_s23, 4  ;;  %s517_s30 = int_to_ptr.vmem [resolvable:$true] %s516_s30 }
  0x36   : > { %3875 = sst [smem:[#allocation44_spill]] %s3024_s6  ;;  %s3794_s0 = scalar_lea.sflag [#allocation9], %s3226_s18 }
  0x37   : > { %3876 = sst [smem:[#allocation45_spill]] %s3028_s4  ;;  %s3797_s10 = smov 64  }
  0x38   : > { %s3214_s20 = scalar_select %p90_p1, %s3016_s12, 1 }
  0x39   : > { %s3878_s1 = sld [smem:[#allocation65_spill]]  ;;  %p168_p12 = scmp.ne.s32.totalorder %s2976_s29, %s2972_s28 }
  0x3a   : > { %s1968_s2 = sshll.u32 %s3214_s20, 2  ;;  %s3886_s3 = sld [smem:[#allocation67_spill]] }
  0x3b   : > { %s3879_s19 = scalar_select %p3239_p6, 1, 0 }
  0x3c   : > { %s3881_s9 = scalar_select %p3253_p9, 1, 0 }
  0x3d   : > { %3880 = sst [smem:[#allocation46_spill]] %s3879_s19  ;;  %p170_p1 = por %p168_p12, %p75_p0 }
  0x3e   : > { %3882 = sst [smem:[#allocation47_spill]] %s3881_s9  ;;  %s3889_s27 = smov 128  }
  0x3f   : > { %s513_s22 = scalar_lea.hbm %s3878_s1, %s1968_s2  ;;  %s3795_s2 = smov 128  }
  0x40   : > { %s514_s13 = sshll.u32 %s513_s22, 4  ;;  %p3272_p2 = pnand %p3815_p5, %p170_p1  ;;  %s515_s13 = int_to_ptr.hbm [resolvable:$true] %s514_s13 }
  0x41   : > { %2355 = dma.hbm_to_vmem [thread:$0]  (!%p3239_p6), %s515_s13, 256, %s517_s30, %s3794_s0, %s3795_s2, %s3797_s10, %s3799_s21  }
  0x42   : > { %s152_s23 = scalar_select %p151_p11, 1, 0 }
  0x43   : > { %s547_s30 = sand.u32 1, %s2976_s29   ;;  %s3887_s29 = smov 4  }
  0x44   : > { %s3267_s1 = scalar_select %p150_p10, %s3016_s12, %s152_s23 }
  0x45   : > { %s3884_s13 = scalar_select %p3272_p2, 1, 0 }
  0x46   : > { %3883 = sst [smem:[#allocation48_spill]] %s3267_s1  ;;  %s1969_s0 = sshll.u32 %s547_s30, 7 }
  0x47   : > { %3885 = sst [smem:[#allocation49_spill]] %s3884_s13  ;;  %s1970_s22 = sshll.u32 %s3267_s1, 2 }
  0x48   : > { %s557_s21 = scalar_lea.hbm %s3886_s3, %s1970_s22  ;;  %s549_s9 = scalar_lea.vmem [#allocation11], %s1969_s0 }
  0x49   : > { %s558_s23 = sshll.u32 %s557_s21, 4  ;;  %s560_s19 = sshll.u32 %s549_s9, 4  ;;  %s559_s23 = int_to_ptr.hbm [resolvable:$true] %s558_s23  ;;  %s561_s19 = int_to_ptr.vmem [resolvable:$true] %s560_s19 }
  0x4a   : > { %s3811_s30 = scalar_lea.sflag [#allocation12], %s3226_s18  ;;  %s3888_s1 = smov 64  }
  0x4b   : > { %2361 = dma.hbm_to_vmem [thread:$0]  (!%p3272_p2), %s559_s23, 2048, %s561_s19, %s3811_s30, %s3889_s27, %s3888_s1, %s3887_s29  }
  0x4c   : > { %s3890_s5 = sld [smem:[#allocation69_spill]]  ;;  %s588_s3 = scalar_lea.vmem [#allocation13], %s1969_s0 }
  0x4d   : > { %s3291_s28 = sshll.u32 %s588_s3, 4  ;;  %p286_p3 = scmp.eq.s32.totalorder %s3020_s11, 2 }
  0x4e   : > { %3891 = sst [smem:[#allocation50_spill]] %s3291_s28  ;;  %p300_p7 = scmp.ne.s32.totalorder %s2964_s26, %s2960_s25 }
  0x4f   : > { %s3301_s14 = scalar_select %p286_p3, %s3016_s12, 0 }
  0x50   : > { %p302_p8 = por %p300_p7, %p75_p0  ;;  %s625_s19 = sand.u32 1, %s2964_s26  }
  0x51   : > { %s1973_s3 = sshll.u32 %s625_s19, 7  ;;  %s1974_s0 = sshll.u32 %s3301_s14, 2 }
  0x52   : > { %s596_s21 = scalar_lea.hbm %s3890_s5, %s1970_s22  ;;  %s3892_s7 = sld [smem:[#allocation71_spill]] }
  0x53   : > { %s597_s9 = sshll.u32 %s596_s21, 4  ;;  %s627_s21 = scalar_lea.vmem [#allocation14], %s1973_s3  ;;  %s3294_s9 = int_to_ptr.hbm [resolvable:$true] %s597_s9 }
  0x54   : > { %s636_s30 = sshll.u32 %s627_s21, 4  ;;  %p3314_p11 = pnand %p3815_p5, %p302_p8  ;;  %s637_s30 = int_to_ptr.vmem [resolvable:$true] %s636_s30 }
  0x55   : > { %s3895_s8 = sld [smem:[#allocation72_spill]]  ;;  %s650_s23 = scalar_lea.vmem [#allocation16], %s1973_s3 }
  0x56   : > { %s3893_s28 = scalar_select %p3314_p11, 1, 0 }
  0x57   : > { %s3814_s5 = scalar_lea.sflag [#allocation15], %s3226_s18  ;;  %s3898_s13 = sld [smem:[#allocation28_spill]] }
  0x58   : > { %s633_s2 = scalar_lea.hbm %s3892_s7, %s1974_s0  ;;  %3894 = sst [smem:[#allocation51_spill]] %s3893_s28 }
  0x59   : > { %s634_s10 = sshll.u32 %s633_s2, 4  ;;  %s3321_s2 = sshll.u32 %s650_s23, 4  ;;  %s635_s10 = int_to_ptr.hbm [resolvable:$true] %s634_s10 }
  0x5a   : > { %3896 = sst [smem:[#allocation52_spill]] %s3321_s2  ;;  %s56_s23 = sadd.s32 1, %s3020_s11 }
  0x5b   : > { %s656_s22 = scalar_lea.hbm %s3895_s8, %s1974_s0  ;;  %s3899_s3 = sld [smem:[#allocation27_spill]] }
  0x5c   : > { %s657_s21 = sshll.u32 %s656_s22, 4  ;;  %s3335_s0 = sadd.s32 4294967295, %s3028_s4   ;;  %s3331_s21 = int_to_ptr.hbm [resolvable:$true] %s657_s21 }
  0x5d   : > { %2367 = dma.hbm_to_vmem [thread:$0]  (!%p3314_p11), %s635_s10, 2048, %s637_s30, %s3814_s5, %s3889_s27, %s3888_s1, %s3887_s29  }
  0x5e   : > { %3897 = sst [smem:[#allocation53_spill]] %s3331_s21  ;;  %s53_s22 = sadd.s32 1, %s3016_s12 }
  0x5f   : > { %p54_p12 = scmp.ge.s32.totalorder %s53_s22, 2  ;;  %s60_s7 = sadd.s32 1, %s3024_s6 }
  0x60   : > { %s67_s30 = sadd.s32 1, %s3000_s17  ;;  %p74_p1 = scmp.ne.s32.totalorder %s3000_s17, %s2996_s16 }
  0x61   : > { %s4016_s22 = smov (%p54_p12, %s53_s22), 0  ;;  %s4018_s23 = smov (!%p54_p12, %s56_s23), %s3020_s11 }
  0x62   : > { %3902 = sst [smem:[#allocation54_spill]] %s4016_s22  ;;  %s3903_s10 = smov %s4016_s22 }
  0x63   : > { %p3349_p3 = por %p75_p0, %p74_p1  ;;  %p80_p7 = scmp.ne.s32.totalorder %s2996_s16, %s2992_s15 }
  0x64   : > { %p58_p8 = scmp.ge.s32.totalorder %s4018_s23, 3  ;;  %p81_p5 = scmp.eq.s32.totalorder %s3335_s0, 0 }
  0x65   : > { %s3905_s19 = sld [smem:[#allocation36_spill]]  ;;  %s3950_s5 = smov 64  }
  0x66   : > { %s4020_s23 = smov (%p58_p8, %s4018_s23), 0  ;;  %s4022_s7 = smov (!%p58_p8, %s60_s7), %s3024_s6 }
  0x67   : > { %3906 = sst [smem:[#allocation55_spill]] %s4020_s23  ;;  %s3907_s12 = smov %s4020_s23 }
  0x68   : > { %s3908_s22 = sld [smem:[#allocation32_spill]]  ;;  %p3364_p0 = por %p81_p5, %p80_p7 }
  0x69   : > { %s3909_s11 = sld [smem:[#allocation31_spill]]  ;;  %p92_p12 = scmp.eq.s32.totalorder %s3907_s12, 0 }
  0x6a   : > { %s3910_s27 = scalar_select %p3364_p0, 1, 0 }
  0x6b   : > { %p62_p1 = scmp.ge.s32.totalorder %s4022_s7, 2  ;;  %p3374_p10 = por %p110_p4, %p81_p5 }
  0x6c   : > { %3911 = sst [smem:[#allocation34_spill]] %s3910_s27  ;;  %p154_p7 = scmp.eq.s32.totalorder %s3907_s12, 1 }
  0x6d   : > { %s3912_s15 = scalar_select %p3374_p10, 1, 0 }
  0x6e   : > { %s3914_s23 = sld [smem:[#allocation48_spill]]  ;;  %s4024_s7 = smov (%p62_p1, %s4022_s7), 0 }
  0x6f   : > { %3913 = sst [smem:[#allocation31_spill]] %s3912_s15  ;;  %s64_s16 = ssub.s32 %s3024_s6, %s4024_s7 }
  0x70   : > { %s93_s2 = scalar_select %p92_p12, %s3903_s10, 1 }
  0x71   : > { %3915 = sst [smem:[#allocation56_spill]] %s4024_s7  ;;  %p65_p13 = scmp.eq.s32.totalorder %s64_s16, 0 }
  0x72   : > { %s94_s27 = ssub.s32 %s3214_s20, %s93_s2  ;;  %s3916_s1 = sld [smem:[#allocation33_spill]] }
  0x73   : > { %p95_p8 = scmp.eq.s32.totalorder %s94_s27, 0  ;;  %p155_p4 = scmp.ne.s32.totalorder %s3907_s12, 0 }
  0x74   : > { %s3917_s8 = sadd.s32 1, %s3905_s19  ;;  %s3920_s29 = sld [smem:[#allocation26_spill]] }
  0x75   : > { %s3389_s28 = scalar_select %p95_p8, %s3905_s19, %s3917_s8  }
  0x76   : > { %s3392_s15 = scalar_select %p65_p13, %s3000_s17, %s67_s30  }
  0x77   : > { %3918 = sst [smem:[#allocation57_spill]] %s3389_s28  ;;  %p3921_p12 = scmp.ne.s32.totalorder %s3908_s22, %s3909_s11 }
  0x78   : > { %3919 = sst [smem:[#allocation58_spill]] %s3392_s15  ;;  %p288_p10 = scmp.eq.s32.totalorder %s3907_s12, 2 }
  0x79   : > { %s156_s21 = scalar_select %p155_p4, 1, 0 }
  0x7a   : > { %p3399_p1 = por %p3921_p12, %p81_p5  ;;  %p3923_p13 = scmp.ne.s32.totalorder %s2960_s25, %s2956_s24 }
  0x7b   : > { %s157_s2 = scalar_select %p154_p7, %s3903_s10, %s156_s21 }
  0x7c   : > { %s3922_s27 = scalar_select %p3399_p1, 1, 0 }
  0x7d   : > { %s289_s8 = scalar_select %p288_p10, %s3903_s10, 0 }
  0x7e   : > { %s158_s30 = ssub.s32 %s3914_s23, %s157_s2  ;;  %p3412_p8 = por %p3923_p13, %p81_p5 }
  0x7f   : > { %p159_p4 = scmp.eq.s32.totalorder %s158_s30, 0  ;;  %s290_s11 = ssub.s32 %s3301_s14, %s289_s8 }
  0x80   : > { %s3924_s7 = scalar_select %p3412_p8, 1, 0 }
  0x81   : > { %p291_p12 = scmp.eq.s32.totalorder %s290_s11, 0  ;;  %s412_s22 = sor.u32 %s290_s11, %s64_s16 }
  0x82   : > { %3925 = sst [smem:[#allocation48_spill]] %s3924_s7  ;;  %s3926_s15 = sadd.s32 1, %s3916_s1 }
  0x83   : > { %s4026_s1 = smov (!%p159_p4, %s3916_s1), %s3926_s15  ;;  %s3928_s12 = sadd.s32 1, %s2964_s26 }
  0x84   : > { %3927 = sst [smem:[#allocation59_spill]] %s4026_s1  ;;  %p413_p10 = scmp.eq.s32.totalorder %s412_s22, 0 }
  0x85   : > { %s3425_s28 = scalar_select %p291_p12, %s2964_s26, %s3928_s12  }
  0x86   : > { %p426_p7 = scmp.eq.s32.totalorder %s3335_s0, 11  ;;  %p431_p1 = scmp.ne.s32.totalorder %s3899_s3, %s3920_s29 }
  0x87   : > { %3929 = sst [smem:[#allocation60_spill]] %s3425_s28  ;;  %s3930_s24 = sadd.s32 4294967294, %s3028_s4  }
  0x88   : > { %p432_p5 = scmp.eq.s32.totalorder %s3930_s24, 11  ;;  %s3931_s21 = sadd.s32 1, %s3898_s13 }
  0x89   : > { %s3435_s23 = scalar_select %p413_p10, %s3898_s13, %s3931_s21  }
  0x8a   : > { %p3933_p13 = scmp.ne.s32.totalorder %s3898_s13, %s3899_s3  ;;  %p3444_p4 = por %p432_p5, %p431_p1 }
  0x8b   : > { %3932 = sst [smem:[#allocation61_spill]] %s3435_s23  ;;  %s484_s16 = sand.u32 1, %s3000_s17  }
  0x8c   : > { %p3440_p8 = por %p426_p7, %p3933_p13  ;;  %s1966_s15 = sshll.u32 %s3024_s6, 2 }
  0x8d   : > { %s3936_s12 = scalar_select %p3444_p4, 1, 0 }
  0x8e   : > { %s3934_s14 = scalar_select %p3440_p8, 1, 0 }
  0x8f   : > { %3937 = sst [smem:[#allocation63_spill]] %s3936_s12  ;;  %s1965_s2 = sshll.u32 %s484_s16, 2 }
  0x90   : > { %3935 = sst [smem:[#allocation62_spill]] %s3934_s14  ;;  %s488_s28 = scalar_lea.vmem [#allocation5], %s1965_s2 }
  0x91   : > { %s3938_s30 = sld [smem:[#allocation64_spill]]  ;;  %s496_s26 = sshll.u32 %s488_s28, 4  ;;  %s497_s26 = int_to_ptr.vmem [resolvable:$true] %s496_s26 }
  0x92   : > { %s3941_s13 = sld [smem:[#allocation50_spill]]  ;;  %p3945_p1 = scmp.lt.s32.totalorder %s3028_s4, 12 }
  0x93   : > { %s3943_s10 = sld [smem:[#allocation52_spill]]  ;;  %s3948_s2 = scalar_lea.sflag [#allocation9], %s3226_s18 }
  0x94   : > { %s3944_s1 = sld [smem:[#allocation53_spill]]  ;;  %p2350_p12 = pnand %p3945_p1, %p3349_p3 }
  0x95   : > { %s3946_s6 = sld [smem:[#allocation66_spill]]  ;;  %s3949_s28 = smov 4  }
  0x96   : > { %s3951_s4 = smov 128   ;;  %s3952_s14 = scalar_lea.sflag [#allocation12], %s3226_s18 }
  0x97   : > { %s492_s22 = scalar_lea.hbm %s3938_s30, %s1966_s15  ;;  %s3947_s30 = sand.u32 1, %s3905_s19  }
  0x98   : > { %s494_s3 = sshll.u32 %s492_s22, 4  ;;  %s529_s17 = scalar_lea.vmem [#allocation10], %s3947_s30  ;;  %s495_s3 = int_to_ptr.hbm [resolvable:$true] %s494_s3 }
  0x99   : > { %s538_s23 = sshll.u32 %s529_s17, 4  ;;  %s485_s22 = scalar_lea.sflag [#allocation6], %s484_s16  ;;  %s539_s23 = int_to_ptr.vmem [resolvable:$true] %s538_s23 }
  0x9a   : > { %2352 = dma.hbm_to_vmem [thread:$0]  (!%p2350_p12), %s495_s3, 64, %s497_s26, %s485_s22  }
  0x9b   : > { %s534_s15 = scalar_lea.hbm %s3946_s6, %s3214_s20  ;;  %s3953_s7 = int_to_ptr.vmem [resolvable:$true] %s3941_s13 }
  0x9c   : > { %s536_s12 = sshll.u32 %s534_s15, 4  ;;  %s3954_s6 = scalar_lea.sflag [#allocation15], %s3226_s18  ;;  %s537_s12 = int_to_ptr.hbm [resolvable:$true] %s536_s12 }
  0x9d   : > { %2358 = dma.hbm_to_vmem [thread:$0]  (!%p3239_p6), %s537_s12, 16, %s539_s23, %s3948_s2  }
  0x9e   : > { %2364 = dma.hbm_to_vmem [thread:$0]  (!%p3272_p2), %s3294_s9, 2048, %s3953_s7, %s3952_s14, %s3951_s4, %s3950_s5, %s3949_s28  }
  0x9f   : > { %s3955_s17 = int_to_ptr.vmem [resolvable:$true] %s3943_s10  ;;  %691 = sbr.rel (%p3253_p9) target bundleno = 774 (0x306), region = 64 }
  0xa0   : > { %2370 = dma.hbm_to_vmem [thread:$0]  (!%p3314_p11), %s3944_s1, 2048, %s3955_s17, %s3954_s6, %s3951_s4, %s3950_s5, %s3949_s28  }
  0xa1   : > { %s3957_s20 = sld [smem:[#allocation37_spill]] (!%p3253_p9) }
  0xa7   : > { %s693_s23 = sand.u32 1, %s3957_s20  }
  0xa8   : > { %s3490_s12 = sshll.u32 %s693_s23, 2  ;;  %s694_s16 = scalar_lea.sflag [#allocation6], %s693_s23 }
  0xa9   : > { %2919 = dma.done.wait (%p3364_p0), %s694_s16, 64  }
  0xaa   : > { %2921 = vsyncadd (%p3364_p0), %s694_s16, 4294967232  ;;  %s3959_s7 = sld [smem:[#allocation35_spill]]  ;;  %s703_s1 = sand.u32 1, %s3335_s0  }
  0xab   : > { %s3960_s18 = sld [smem:[#allocation31_spill]]  ;;  %s704_s10 = scalar_lea.sflag [#allocation9], %s703_s1 }
  0xb0   : > { %s705_s4 = sand.u32 1, %s3959_s7  }
  0xb1   : > { %s3499_s9 = sshll.u32 %s705_s4, 4  ;;  %p3961_p6 = scmp.ne.s32.totalorder %s3960_s18, 0 }
  0xb3   : > { %2923 = dma.done.wait (%p3961_p6), %s704_s10, 272  }
  0xb4   : > { %2925 = vsyncadd (%p3961_p6), %s704_s10, 4294967024  ;;  %s3962_s24 = sld [smem:[#allocation32_spill]]  ;;  %s3507_s21 = scalar_lea.vmem [#allocation10], %s705_s4 }
  0xb5   : > { %s723_s8 = scalar_lea.sflag [#allocation12], %s703_s1  ;;  %p3963_p9 = scmp.ne.s32.totalorder %s3922_s27, 0 }
  0xba   : > { %s724_s13 = sand.u32 1, %s3962_s24  }
  0xbb   : > { %s1980_s3 = sshll.u32 %s724_s13, 7 }
  0xbc   : > { %s3509_s29 = scalar_lea.vmem [#allocation11], %s1980_s3 }
  0xbd   : > { %2927 = dma.done.wait (%p3963_p9), %s723_s8, 4096  }
  0xbe   : > { %2929 = vsyncadd (%p3963_p9), %s723_s8, 4294963200  ;;  %s3964_s0 = sld [smem:[#allocation48_spill]]  ;;  %s744_s15 = sand.u32 1, %s2960_s25  }
  0xbf   : > { %s1982_s30 = sshll.u32 %s744_s15, 7  ;;  %s3516_s22 = scalar_lea.vmem [#allocation13], %s1980_s3 }
  0xc0   : > { %s743_s2 = scalar_lea.sflag [#allocation15], %s703_s1  ;;  %s3518_s28 = scalar_lea.vmem [#allocation14], %s1982_s30 }
  0xc4   : > { %p3965_p2 = scmp.ne.s32.totalorder %s3964_s0, 0 }
  0xc6   : > { %2931 = dma.done.wait (%p3965_p2), %s743_s2, 4096  }
  0xc7   : > { %2933 = vsyncadd (%p3965_p2), %s743_s2, 4294963200  ;;  %s3966_s5 = sld [smem:[#allocation27_spill]]  ;;  %s3559_s14 = scalar_lea.vmem [#allocation16], %s1982_s30 }
  0xc8   : > { %s3967_s6 = sld [smem:[#allocation40_spill]] }
  0xc9   : > { %s3968_s27 = sld [smem:[#allocation39_spill]] }
  0xca   : > { %s3969_s18 = sld [smem:[#allocation73_spill]] }
  0xcb   : > { %s3970_s24 = sld [smem:[#allocation74_spill]] }
  0xcc   : > { %s3971_s0 = sld [smem:[#allocation68_spill]] }
  0xcd   : > { %s3525_s17 = sand.u32 1, %s3966_s5  }
  0xce   : > { %s1984_s26 = sshll.u32 %s3525_s17, 2  ;;  %p864_p11 = scmp.eq.s32.totalorder %s3967_s6, 1 }
  0xcf   : > { %p865_p3 = scmp.ne.s32.totalorder %s3967_s6, 0  ;;  %p894_p0 = scmp.eq.s32.totalorder %s3967_s6, 2 }
  0xd0   : > { %s3561_s25 = scalar_lea.vmem [#allocation17], %s1984_s26  ;;  %s3563_s16 = scalar_lea.vmem [#allocation18], %s1984_s26 }
  0xd1   : > { %s866_s20 = scalar_select %p865_p3, 1, 0 }
  0xd2   : > { %s3534_s19 = scalar_select %p894_p0, %s3968_s27, 0 }
  0xd3   : > { %s4028_s27 = smov (!%p864_p11, %s3968_s27), %s866_s20  ;;  %s3972_s20 = sld [smem:[#allocation70_spill]] }
  0xd4   : > { %p896_p10 = scmp.lt.s32.totalorder %s3534_s19, 1  ;;  %p868_p7 = scmp.lt.s32.totalorder %s4028_s27, 1 }
  0xd5   : > { %916 = sbr.rel (%p865_p3) target bundleno = 360 (0x168), region = 96  ;;  %s3973_s7 = scalar_lea.vmem (!%p865_p3), [#allocation8], %s3499_s9 }
  0xd6   : > { %s3539_s23 = scalar_select %p896_p10, %s3534_s19, 1 }
  0xd7   : > { %s4030_s27 = smov (!%p868_p7, %s4028_s27), 1  ;;  %s3975_s4 = smov (!%p865_p3), %s3973_s7 }
  0xd8   : > { %s898_s1 = scalar_lea.vmem %s3969_s18, %s3539_s23  ;;  %s905_s13 = scalar_lea.vmem %s3970_s24, %s3539_s23 }
  0xd9   : > { %s870_s15 = scalar_lea.vmem %s3971_s0, %s4030_s27  ;;  %s885_s11 = scalar_lea.vmem %s3972_s20, %s4030_s27 }
  0xda   : > { %s3974_s18 = sld [smem:[#allocation39_spill]]  ;;  %v2266_v0 = vld [vmem:[%s3973_s7 + $0x8] sm:$0xff]  ;;  %v2265_v1 = vld [vmem:[%s3975_s4] sm:$0xff]  ;;  %s3976_s30 = scalar_lea.vmem [#allocation5], %s3490_s12  ;;  %vm938_vm0 = vcmask 261120  }
  0xdb   : > { %948 = vmatpush.bf16.msra.mxu0 %v2266_v0  ;;  %v917_v2 = vld [vmem:[%s3976_s30] sm:$0xf]  ;;  %v2559_v3 = vld [vmem:[%s3507_s21] ss:$0 sm:$0xff] }
  0xdf   : > { %949 = vmatpush.bf16.msra.mxu0 %v2265_v1 }
  0xe0   : > { %s1996_s26 = sshll.u32 %s3974_s18, 2 }
  0xe1   : > { %s957_s6 = scalar_lea.vmem [#allocation2], %s1996_s26 }
  0xe2   : > { %1995 = vmatmul.msk.bf16.vlgmr.msra.gmra.mxu0 %vm938_vm0, %v917_v2 }
 0x15f   : > { %v951_v4 = vpop.f32.mrf.mxu0 }
 0x160   : > { %v952_v5 = vadd.f32 %v2559_v3, %v951_v4 }
 0x162   : > { %v955_v6 = vpack.c.bf16 %v952_v5, %v952_v5 }
 0x164   : > { %958 = vst [vmem:[%s957_s6] sm:$0xf] %v955_v6 }
 0x167   : > { %v953_v7 = vpop.f32.mrf.mxu0 }
 0x168 PF: > { %s3977_s10 = sld [smem:[#allocation40_spill]] }
 0x16e   : > { %p1997_p5 = scmp.ne.s32.totalorder %s3977_s10, 1 }
 0x16f   : > { %s3978_s12 = sld [smem:[#allocation39_spill]] (!%p1997_p5) }
 0x170   : > { %962 = sbr.rel (%p1997_p5) target bundleno = 549 (0x225), region = 100 }
 0x175   : > { %v2290_v8 = vld [vmem:[%s3509_s29 + $0x78] sm:$0xff]  ;;  %v2289_v12 = vld [vmem:[%s3509_s29 + $0x70] sm:$0xff]  ;;  %v2288_v16 = vld [vmem:[%s3509_s29 + $0x68] sm:$0xff] }
 0x176   : > { %v2274_v9 = vld [vmem:[%s3509_s29 + $0x38] sm:$0xff]  ;;  %1062 = vmatpush.bf16.msra.mxu0 %v2290_v8  ;;  %v2273_v13 = vld [vmem:[%s3509_s29 + $0x30] sm:$0xff]  ;;  %v2272_v17 = vld [vmem:[%s3509_s29 + $0x28] sm:$0xff] }
 0x177   : > { %v2298_v10 = vld [vmem:[%s3516_s22 + $0x78] sm:$0xff]  ;;  %1123 = vmatpush.bf16.msra.mxu1 %v2274_v9  ;;  %v2297_v14 = vld [vmem:[%s3516_s22 + $0x70] sm:$0xff]  ;;  %v2296_v18 = vld [vmem:[%s3516_s22 + $0x68] sm:$0xff] }
 0x178   : > { %v2282_v11 = vld [vmem:[%s3516_s22 + $0x38] sm:$0xff]  ;;  %1200 = vmatpush.bf16.msra.mxu2 %v2298_v10  ;;  %v2281_v15 = vld [vmem:[%s3516_s22 + $0x30] sm:$0xff]  ;;  %v2280_v19 = vld [vmem:[%s3516_s22 + $0x28] sm:$0xff] }
 0x179   : > { %1261 = vmatpush.bf16.msra.mxu3 %v2282_v11  ;;  %v2287_v20 = vld [vmem:[%s3509_s29 + $0x60] sm:$0xff]  ;;  %v2286_v24 = vld [vmem:[%s3509_s29 + $0x58] sm:$0xff]  ;;  %v2285_v28 = vld [vmem:[%s3509_s29 + $0x50] sm:$0xff] }
 0x17a   : > { %1063 = vmatpush.bf16.msra.mxu0 %v2289_v12  ;;  %v2271_v21 = vld [vmem:[%s3509_s29 + $0x20] sm:$0xff]  ;;  %v2270_v25 = vld [vmem:[%s3509_s29 + $0x18] sm:$0xff]  ;;  %v2269_v29 = vld [vmem:[%s3509_s29 + $0x10] sm:$0xff] }
 0x17b   : > { %1124 = vmatpush.bf16.msra.mxu1 %v2273_v13  ;;  %v2295_v22 = vld [vmem:[%s3516_s22 + $0x60] sm:$0xff]  ;;  %v2294_v26 = vld [vmem:[%s3516_s22 + $0x58] sm:$0xff]  ;;  %v2293_v30 = vld [vmem:[%s3516_s22 + $0x50] sm:$0xff] }
 0x17c   : > { %1201 = vmatpush.bf16.msra.mxu2 %v2297_v14  ;;  %v2279_v23 = vld [vmem:[%s3516_s22 + $0x20] sm:$0xff]  ;;  %v2278_v27 = vld [vmem:[%s3516_s22 + $0x18] sm:$0xff]  ;;  %v2277_v31 = vld [vmem:[%s3516_s22 + $0x10] sm:$0xff] }
 0x17d   : > { %1262 = vmatpush.bf16.msra.mxu3 %v2281_v15  ;;  %v2284_v32 = vld [vmem:[%s3509_s29 + $0x48] sm:$0xff]  ;;  %v2283_v36 = vld [vmem:[%s3509_s29 + $0x40] sm:$0xff]  ;;  %v2560_v42 = vld [vmem:[%s870_s15] ss:$0 sm:$0xff] }
 0x17e   : > { %1064 = vmatpush.bf16.msra.mxu0 %v2288_v16  ;;  %v2268_v33 = vld [vmem:[%s3509_s29 + $0x8] sm:$0xff]  ;;  %v2267_v37 = vld [vmem:[%s3509_s29] sm:$0xff]  ;;  %s2126_s29 = sshll.u32 %s3978_s12, 2  ;;  %v2561_v48 = vld [vmem:[%s885_s11] ss:$0 sm:$0xff] }
 0x17f   : > { %1125 = vmatpush.bf16.msra.mxu1 %v2272_v17  ;;  %v2292_v34 = vld [vmem:[%s3516_s22 + $0x48] sm:$0xff]  ;;  %v2291_v38 = vld [vmem:[%s3516_s22 + $0x40] sm:$0xff]  ;;  %s1282_s0 = scalar_lea.vmem [#allocation3], %s2126_s29  ;;  %s1292_s15 = scalar_lea.vmem [#allocation4], %s2126_s29 }
 0x180   : > { %1202 = vmatpush.bf16.msra.mxu2 %v2296_v18  ;;  %v2276_v35 = vld [vmem:[%s3516_s22 + $0x8] sm:$0xff]  ;;  %v2275_v39 = vld [vmem:[%s3516_s22] sm:$0xff] }
 0x181   : > { %1263 = vmatpush.bf16.msra.mxu3 %v2280_v19  ;;  %v997_v40 = vld [vmem:[#allocation2 + $0x4] sm:$0xf]  ;;  %v963_v41 = vld [vmem:[#allocation2] sm:$0xf] }
 0x182   : > { %1065 = vmatpush.bf16.msra.mxu0 %v2287_v20 }
 0x183   : > { %1126 = vmatpush.bf16.msra.mxu1 %v2271_v21 }
 0x184   : > { %1203 = vmatpush.bf16.msra.mxu2 %v2295_v22 }
 0x185   : > { %1264 = vmatpush.bf16.msra.mxu3 %v2279_v23 }
 0x186   : > { %1066 = vmatpush.bf16.msra.mxu0 %v2286_v24 }
 0x187   : > { %1127 = vmatpush.bf16.msra.mxu1 %v2270_v25 }
 0x188   : > { %1204 = vmatpush.bf16.msra.mxu2 %v2294_v26 }
 0x189   : > { %1265 = vmatpush.bf16.msra.mxu3 %v2278_v27 }
 0x18a   : > { %1067 = vmatpush.bf16.msra.mxu0 %v2285_v28 }
 0x18b   : > { %1128 = vmatpush.bf16.msra.mxu1 %v2269_v29 }
 0x18c   : > { %1205 = vmatpush.bf16.msra.mxu2 %v2293_v30 }
 0x18d   : > { %1266 = vmatpush.bf16.msra.mxu3 %v2277_v31 }
 0x18e   : > { %1068 = vmatpush.bf16.msra.mxu0 %v2284_v32 }
 0x18f   : > { %1129 = vmatpush.bf16.msra.mxu1 %v2268_v33 }
 0x190   : > { %1206 = vmatpush.bf16.msra.mxu2 %v2292_v34 }
 0x191   : > { %1267 = vmatpush.bf16.msra.mxu3 %v2276_v35 }
 0x192   : > { %1069 = vmatpush.bf16.msra.mxu0 %v2283_v36 }
 0x193   : > { %1130 = vmatpush.bf16.msra.mxu1 %v2267_v37 }
 0x194   : > { %1207 = vmatpush.bf16.msra.mxu2 %v2291_v38 }
 0x195   : > { %1268 = vmatpush.bf16.msra.mxu3 %v2275_v39  ;;  %1070 = vmatmul.bf16.vlgmr.msra.gmra.mxu0 %v997_v40 }
 0x196   : > { %1131 = vmatmul.bf16.vlgmr.msra.gmra.mxu1 %v963_v41 }
 0x197   : > { %1208 = vmatmul.bf16.vlgmr.msra.gmra.mxu2 %v997_v40 }
 0x198   : > { %1269 = vmatmul.bf16.vlgmr.msra.gmra.mxu3 %v963_v41 }
 0x212   : > { %v1071_v43 = vpop.f32.mrf.mxu0 }
 0x213   : > { %v1132_v44 = vpop.f32.mrf.mxu1 }
 0x214   : > { %v1133_v45 = vadd.f32 %v1132_v44, %v1071_v43 }
 0x216   : > { %v1278_v46 = vadd.f32 %v2560_v42, %v1133_v45 }
 0x218   : > { %v1279_v47 = vmax.f32 %v1278_v46, 0.0 }
 0x21a   : > { %v1280_v49 = vpack.c.bf16 %v1279_v47, %v1279_v47  ;;  %v1209_v50 = vpop.f32.mrf.mxu2  ;;  %v1073_v53 = vpop.f32.mrf.mxu0 }
 0x21b   : > { %v1270_v51 = vpop.f32.mrf.mxu3  ;;  %v1134_v54 = vpop.f32.mrf.mxu1 }
 0x21c   : > { %v1271_v52 = vadd.f32 %v1270_v51, %v1209_v50  ;;  %1283 = vst [vmem:[%s1282_s0] sm:$0xf] %v1280_v49 }
 0x21e   : > { %v1288_v55 = vadd.f32 %v2561_v48, %v1271_v52 }
 0x220   : > { %v1289_v56 = vmax.f32 %v1288_v55, 0.0 }
 0x222   : > { %v1290_v57 = vpack.c.bf16 %v1289_v56, %v1289_v56  ;;  %v1211_v58 = vpop.f32.mrf.mxu2 }
 0x223   : > { %v1272_v59 = vpop.f32.mrf.mxu3 }
 0x224   : > { %1293 = vst [vmem:[%s1292_s15] sm:$0xf] %v1290_v57 }
 0x225 PF: > { %s3981_s2 = sld [smem:[#allocation40_spill]] }
 0x22b   : > { %p2128_p13 = scmp.ne.s32.totalorder %s3981_s2, 2 }
 0x22d   : > { %1297 = sbr.rel (%p2128_p13) target bundleno = 738 (0x2e2), region = 104 }
 0x232   : > { %v2322_v60 = vld [vmem:[%s3518_s28 + $0x78] sm:$0xff]  ;;  %v2321_v0 = vld [vmem:[%s3518_s28 + $0x70] sm:$0xff]  ;;  %v2320_v4 = vld [vmem:[%s3518_s28 + $0x68] sm:$0xff] }
 0x233   : > { %v2306_v61 = vld [vmem:[%s3518_s28 + $0x38] sm:$0xff]  ;;  %1398 = vmatpush.bf16.msra.mxu0 %v2322_v60  ;;  %v2305_v1 = vld [vmem:[%s3518_s28 + $0x30] sm:$0xff]  ;;  %v2304_v5 = vld [vmem:[%s3518_s28 + $0x28] sm:$0xff] }
 0x234   : > { %v2330_v62 = vld [vmem:[%s3559_s14 + $0x78] sm:$0xff]  ;;  %1459 = vmatpush.bf16.msra.mxu1 %v2306_v61  ;;  %v2329_v2 = vld [vmem:[%s3559_s14 + $0x70] sm:$0xff]  ;;  %v2328_v6 = vld [vmem:[%s3559_s14 + $0x68] sm:$0xff] }
 0x235   : > { %v2314_v63 = vld [vmem:[%s3559_s14 + $0x38] sm:$0xff]  ;;  %1538 = vmatpush.bf16.msra.mxu2 %v2330_v62  ;;  %v2313_v3 = vld [vmem:[%s3559_s14 + $0x30] sm:$0xff]  ;;  %v2312_v7 = vld [vmem:[%s3559_s14 + $0x28] sm:$0xff] }
 0x236   : > { %1599 = vmatpush.bf16.msra.mxu3 %v2314_v63  ;;  %v2319_v8 = vld [vmem:[%s3518_s28 + $0x60] sm:$0xff]  ;;  %v2318_v12 = vld [vmem:[%s3518_s28 + $0x58] sm:$0xff]  ;;  %v2317_v16 = vld [vmem:[%s3518_s28 + $0x50] sm:$0xff] }
 0x237   : > { %1399 = vmatpush.bf16.msra.mxu0 %v2321_v0  ;;  %v2303_v9 = vld [vmem:[%s3518_s28 + $0x20] sm:$0xff]  ;;  %v2302_v13 = vld [vmem:[%s3518_s28 + $0x18] sm:$0xff]  ;;  %v2301_v17 = vld [vmem:[%s3518_s28 + $0x10] sm:$0xff] }
 0x238   : > { %1460 = vmatpush.bf16.msra.mxu1 %v2305_v1  ;;  %v2327_v10 = vld [vmem:[%s3559_s14 + $0x60] sm:$0xff]  ;;  %v2326_v14 = vld [vmem:[%s3559_s14 + $0x58] sm:$0xff]  ;;  %v2325_v18 = vld [vmem:[%s3559_s14 + $0x50] sm:$0xff] }
 0x239   : > { %1539 = vmatpush.bf16.msra.mxu2 %v2329_v2  ;;  %v2311_v11 = vld [vmem:[%s3559_s14 + $0x20] sm:$0xff]  ;;  %v2310_v15 = vld [vmem:[%s3559_s14 + $0x18] sm:$0xff]  ;;  %v2309_v19 = vld [vmem:[%s3559_s14 + $0x10] sm:$0xff] }
 0x23a   : > { %1600 = vmatpush.bf16.msra.mxu3 %v2313_v3  ;;  %v2316_v20 = vld [vmem:[%s3518_s28 + $0x48] sm:$0xff]  ;;  %v2315_v24 = vld [vmem:[%s3518_s28 + $0x40] sm:$0xff]  ;;  %v1473_v30 = vld [vmem:[#allocation4 + $0x4] sm:$0xf] }
 0x23b   : > { %1400 = vmatpush.bf16.msra.mxu0 %v2320_v4  ;;  %v2300_v21 = vld [vmem:[%s3518_s28 + $0x8] sm:$0xff]  ;;  %v2299_v25 = vld [vmem:[%s3518_s28] sm:$0xff]  ;;  %v2562_v32 = vld [vmem:[%s898_s1] ss:$0 sm:$0xff] }
 0x23c   : > { %1461 = vmatpush.bf16.msra.mxu1 %v2304_v5  ;;  %v2324_v22 = vld [vmem:[%s3559_s14 + $0x48] sm:$0xff]  ;;  %v2323_v26 = vld [vmem:[%s3559_s14 + $0x40] sm:$0xff]  ;;  %v2563_v41 = vld [vmem:[%s905_s13] ss:$0 sm:$0xff] }
 0x23d   : > { %1540 = vmatpush.bf16.msra.mxu2 %v2328_v6  ;;  %v2308_v23 = vld [vmem:[%s3559_s14 + $0x8] sm:$0xff]  ;;  %v2307_v27 = vld [vmem:[%s3559_s14] sm:$0xff] }
 0x23e   : > { %1601 = vmatpush.bf16.msra.mxu3 %v2312_v7  ;;  %v1333_v28 = vld [vmem:[#allocation3 + $0x4] sm:$0xf]  ;;  %v1298_v29 = vld [vmem:[#allocation3] sm:$0xf]  ;;  %v1315_v31 = vld [vmem:[#allocation4] sm:$0xf] }
 0x23f   : > { %1401 = vmatpush.bf16.msra.mxu0 %v2319_v8 }
 0x240   : > { %1462 = vmatpush.bf16.msra.mxu1 %v2303_v9 }
 0x241   : > { %1541 = vmatpush.bf16.msra.mxu2 %v2327_v10 }
 0x242   : > { %1602 = vmatpush.bf16.msra.mxu3 %v2311_v11 }
 0x243   : > { %1402 = vmatpush.bf16.msra.mxu0 %v2318_v12 }
 0x244   : > { %1463 = vmatpush.bf16.msra.mxu1 %v2302_v13 }
 0x245   : > { %1542 = vmatpush.bf16.msra.mxu2 %v2326_v14 }
 0x246   : > { %1603 = vmatpush.bf16.msra.mxu3 %v2310_v15 }
 0x247   : > { %1403 = vmatpush.bf16.msra.mxu0 %v2317_v16 }
 0x248   : > { %1464 = vmatpush.bf16.msra.mxu1 %v2301_v17 }
 0x249   : > { %1543 = vmatpush.bf16.msra.mxu2 %v2325_v18 }
 0x24a   : > { %1604 = vmatpush.bf16.msra.mxu3 %v2309_v19 }
 0x24b   : > { %1404 = vmatpush.bf16.msra.mxu0 %v2316_v20 }
 0x24c   : > { %1465 = vmatpush.bf16.msra.mxu1 %v2300_v21 }
 0x24d   : > { %1544 = vmatpush.bf16.msra.mxu2 %v2324_v22 }
 0x24e   : > { %1605 = vmatpush.bf16.msra.mxu3 %v2308_v23 }
 0x24f   : > { %1405 = vmatpush.bf16.msra.mxu0 %v2315_v24 }
 0x250   : > { %1466 = vmatpush.bf16.msra.mxu1 %v2299_v25 }
 0x251   : > { %1545 = vmatpush.bf16.msra.mxu2 %v2323_v26 }
 0x252   : > { %1606 = vmatpush.bf16.msra.mxu3 %v2307_v27  ;;  %1406 = vmatmul.bf16.vlgmr.msra.gmra.mxu0 %v1333_v28 }
 0x253   : > { %1467 = vmatmul.bf16.vlgmr.msra.gmra.mxu1 %v1298_v29 }
 0x254   : > { %1546 = vmatmul.bf16.vlgmr.msra.gmra.mxu2 %v1473_v30 }
 0x255   : > { %1607 = vmatmul.bf16.vlgmr.msra.gmra.mxu3 %v1315_v31 }
 0x2cf   : > { %v1407_v33 = vpop.f32.mrf.mxu0 }
 0x2d0   : > { %v1468_v34 = vpop.f32.mrf.mxu1 }
 0x2d1   : > { %v1469_v35 = vadd.f32 %v1468_v34, %v1407_v33 }
 0x2d3   : > { %v1616_v36 = vadd.f32 %v2562_v32, %v1469_v35 }
 0x2d5   : > { %v1617_v37 = vpack.c.bf16 %v1616_v36, %v1616_v36 }
 0x2d7   : > { %1618 = vst [vmem:[%s3563_s16] sm:$0xf] %v1617_v37  ;;  %v1547_v38 = vpop.f32.mrf.mxu2  ;;  %v1409_v42 = vpop.f32.mrf.mxu0 }
 0x2d8   : > { %v1608_v39 = vpop.f32.mrf.mxu3  ;;  %v1470_v43 = vpop.f32.mrf.mxu1 }
 0x2d9   : > { %v1609_v40 = vadd.f32 %v1608_v39, %v1547_v38 }
 0x2db   : > { %v1619_v44 = vadd.f32 %v1609_v40, %v1469_v35 }
 0x2dd   : > { %v1624_v45 = vadd.f32 %v2563_v41, %v1619_v44 }
 0x2df   : > { %v1625_v46 = vpack.c.bf16 %v1624_v45, %v1624_v45  ;;  %v1549_v47 = vpop.f32.mrf.mxu2 }
 0x2e0   : > { %v1610_v48 = vpop.f32.mrf.mxu3 }
 0x2e1   : > { %1626 = vst [vmem:[%s3561_s25] sm:$0xf] %v1625_v46 }
 0x2e2 PF: > { %s3984_s1 = sld [smem:[#allocation41_spill]]  ;;  %s1649_s30 = sshll.u32 %s3561_s25, 4  ;;  %s1650_s30 = int_to_ptr.vmem [resolvable:$true] %s1649_s30 }
 0x2e3   : > { %s3986_s6 = sld [smem:[#allocation75_spill]]  ;;  %s1667_s8 = sshll.u32 %s3563_s16, 4  ;;  %s1668_s8 = int_to_ptr.vmem [resolvable:$true] %s1667_s8 }
 0x2e4   : > { %s3988_s29 = sld [smem:[#allocation76_spill]]  ;;  %s1628_s0 = scalar_lea.sflag [#allocation7], %s3525_s17 }
 0x2e8   : > { %s2259_s18 = sshll.u32 %s3984_s1, 1 }
 0x2e9   : > { %s1645_s4 = sadd.s32 %s2259_s18, %s3534_s19  ;;  %s3987_s10 = smov %s3986_s6 }
 0x2ea   : > { %s2260_s23 = sshll.u32 %s1645_s4, 2  ;;  %s3989_s3 = smov %s3988_s29 }
 0x2eb   : > { %s1647_s12 = scalar_lea.hbm %s3986_s6, %s2260_s23  ;;  %s1665_s22 = scalar_lea.hbm %s3988_s29, %s2260_s23 }
 0x2ec   : > { %s1651_s9 = sshll.u32 %s1647_s12, 4  ;;  %s2794_s11 = scalar_lea.hbm %s3987_s10, 16  ;;  %s1652_s9 = int_to_ptr.hbm [resolvable:$true] %s1651_s9 }
 0x2ed   : > { %s2788_s15 = sshra.s32 %s1652_s9, 4  ;;  %s2789_s15 = int_to_ptr.hbm [resolvable:$true] %s2788_s15 }
 0x2ee   : > { %s2790_s2 = scalar_lea.hbm %s2789_s15, 4  ;;  %p2795_p9 = scmp.lt.s32.totalorder %s2789_s15, %s3987_s10 }
 0x2ef   : > { %p2791_p1 = scmp.ne.s32.totalorder %s2789_s15, %s2790_s2  ;;  %p2796_p2 = scmp.lt.s32.totalorder %s2794_s11, %s2790_s2 }
 0x2f1   : > { %p2792_p12 = pnand %p2791_p1, %p3440_p8  ;;  %p2797_p11 = por %p2796_p2, %p2795_p9 }
 0x2f3   : > { %p2793_p6 = pneg %p2792_p12 }
 0x2f5   : > { %p2798_p3 = pnand %p2797_p11, %p2793_p6 }
 0x2f7   : > { %2801 = shalt.err (!%p2798_p3)
}
 0x2f8   : > { %2345 = dma.vmem_to_hbm [thread:$0]  (%p3440_p8), %s1650_s30, 64, %s1652_s9, %s1628_s0  }
 0x2f9   : > { %s1669_s16 = sshll.u32 %s1665_s22, 4  ;;  %s1633_s14 = scalar_lea.sflag [#allocation19], %s3525_s17  ;;  %s1670_s16 = int_to_ptr.hbm [resolvable:$true] %s1669_s16 }
 0x2fa   : > { %s2816_s5 = sshra.s32 %s1670_s16, 4  ;;  %s2822_s4 = scalar_lea.hbm %s3989_s3, 16  ;;  %s2817_s5 = int_to_ptr.hbm [resolvable:$true] %s2816_s5 }
 0x2fb   : > { %s2818_s20 = scalar_lea.hbm %s2817_s5, 4  ;;  %p2823_p5 = scmp.lt.s32.totalorder %s2817_s5, %s3989_s3 }
 0x2fc   : > { %p2819_p0 = scmp.ne.s32.totalorder %s2817_s5, %s2818_s20  ;;  %p2824_p13 = scmp.lt.s32.totalorder %s2822_s4, %s2818_s20 }
 0x2fe   : > { %p2820_p10 = pnand %p2819_p0, %p3440_p8  ;;  %p2825_p1 = por %p2824_p13, %p2823_p5 }
 0x300   : > { %p2821_p7 = pneg %p2820_p10 }
 0x302   : > { %p2826_p12 = pnand %p2825_p1, %p2821_p7 }
 0x304   : > { %2829 = shalt.err (!%p2826_p12)
}
 0x305   : > { %2346 = dma.vmem_to_hbm [thread:$0]  (%p3440_p8), %s1668_s8, 64, %s1670_s16, %s1633_s14  }
 0x306 PF: > { %s3990_s17 = sld [smem:[#allocation45_spill]] }
 0x307   : > { %s3991_s30 = sld [smem:[#allocation26_spill]] }
 0x30c   : > { %p2379_p6 = scmp.ge.s32.totalorder %s3990_s17, 2 }
 0x30d   : > { %s1681_s6 = sand.u32 1, %s3991_s30  }
 0x30e   : > { %p2372_p9 = pnand %p2379_p6, %p3444_p4  ;;  %s1682_s12 = scalar_lea.sflag [#allocation7], %s1681_s6 }
 0x310   : > { %p2373_p2 = pneg %p2372_p9 }
 0x312   : > { %2935 = dma.done.wait (%p2373_p2), %s1682_s12, 64  }
 0x313   : > { %2937 = vsyncadd (%p2373_p2), %s1682_s12, 4294967232  ;;  %s1692_s9 = scalar_lea.sflag [#allocation19], %s1681_s6 }
 0x314   : > { %2939 = dma.done.wait (%p2373_p2), %s1692_s9, 64  }
 0x315   : > { %2941 = vsyncadd (%p2373_p2), %s1692_s9, 4294967232  ;;  %s41_s4 = sadd.s32 1, %s3990_s17   ;;  %s3994_s21 = sld [smem:[#allocation27_spill]] }
 0x316   : > { %p3701_p11 = scmp.ge.s32.totalorder %s41_s4, 14   ;;  %s3995_s22 = sld [smem:[#allocation28_spill]] }
 0x317   : > { %s3996_s23 = sld [smem:[#allocation61_spill]] }
 0x318   : > { %s3997_s24 = sld [smem:[#allocation29_spill]] }
 0x319   : > { %s3998_s25 = sld [smem:[#allocation30_spill]] }
 0x31a   : > { %s3999_s26 = sld [smem:[#allocation60_spill]] }
 0x31b   : > { %s4000_s27 = sld [smem:[#allocation32_spill]] }
 0x31c   : > { %s4001_s28 = sld [smem:[#allocation33_spill]] }
 0x31d   : > { %s4002_s29 = sld [smem:[#allocation59_spill]] }
 0x31e   : > { %s4003_s30 = sld [smem:[#allocation35_spill]] }
 0x31f   : > { %s4004_s13 = sld [smem:[#allocation36_spill]] }
 0x320   : > { %s4005_s14 = sld [smem:[#allocation57_spill]] }
 0x321   : > { %s4006_s15 = sld [smem:[#allocation37_spill]] }
 0x322   : > { %s4007_s16 = sld [smem:[#allocation38_spill]] }
 0x323   : > { %s4008_s17 = sld [smem:[#allocation58_spill]] }
 0x324   : > { %s4009_s18 = sld [smem:[#allocation42_spill]] }
 0x325   : > { %s4010_s19 = sld [smem:[#allocation43_spill]]  ;;  %40 = sbr.rel (!%p3701_p11) target bundleno = 36 (0x24), region = 228 }
 0x326   : > { %s4011_s20 = sld [smem:[#allocation44_spill]] }
 0x327   : > { %s4012_s12 = sld [smem:[#allocation54_spill]] }
 0x328   : > { %s4013_s11 = sld [smem:[#allocation55_spill]] }
 0x329   : > { %s4014_s6 = sld [smem:[#allocation56_spill]] }
 0x32a   :  { %1698 = vsyncpa [#allocation6], 1 }
 0x32b   :  { %1700 = vsyncpa [#allocation6 + $0x1], 1 }
 0x32c   :  { %1701 = vsyncpa [#allocation9], 1 }
 0x32d   :  { %1703 = vsyncpa [#allocation9 + $0x1], 1 }
 0x32e   :  { %1704 = vsyncpa [#allocation12], 1 }
 0x32f   :  { %1706 = vsyncpa [#allocation12 + $0x1], 1 }
 0x330   :  { %1707 = vsyncpa [#allocation15], 1 }
 0x331   :  { %1709 = vsyncpa [#allocation15 + $0x1], 1 }
 0x332   :  { %1710 = vsyncpa [#allocation7], 1 }
 0x333   :  { %1712 = vsyncpa [#allocation7 + $0x1], 1 }
 0x334   :  { %1713 = vsyncpa [#allocation19], 1 }
 0x335   :  { %1715 = vsyncpa [#allocation19 + $0x1], 1 }

</bundles_post_ra>
